<compile_context>
chip_gen: v6e
topology: v6e:2x2x1
jax: 0.10.0
libtpu: 0.0.40
codegen_flags: <defaults>
</compile_context>

<pallas_src>
import functools
import math

import jax
import jax.numpy as jnp
from jax.experimental import pallas as pl
from jax.experimental.pallas import tpu as pltpu


# ----------------------------------------------------------------------------
# VMEM budgeting (generation-aware)
# ----------------------------------------------------------------------------
def _vmem_capacity_bytes():
    try:
        return int(pltpu.get_tpu_info().vmem_capacity_bytes)
    except Exception:
        return 64 * 1024 * 1024   # conservative (v7x per-TC size); safe everywhere


_VMEM_CAP = _vmem_capacity_bytes()
_VMEM_LIMIT = int(_VMEM_CAP * 0.75)          # requested scoped-VMEM limit


def _row_tile(n, cap=512):
    """Row tile (multiple of 8) and padded row count. Never returns the whole
    array as a tile for large awkward N; pads instead."""
    n8 = -(-n // 8) * 8
    if n8 <= cap:
        return n8, n8                         # single block (pad n -> n8 if needed)
    start = cap - cap % 8
    for cand in range(start, 127, -8):        # clean divisor in [128, cap]
        if n % cand == 0:
            return cand, n
    tile = start
    return tile, -(-n // tile) * tile         # pad up to a tile multiple


def _time_block(s, b, h, budget_bytes, cap=32):
    """Timesteps per grid step for the recurrence, sized from the VMEM budget."""
    # double-buffered bf16 inputs (2 dirs x (T,B,4H)) + outputs (2 dirs x (T,B,H))
    per_t = 2 * 2 * (b * 4 * h * 2) + 2 * 2 * (b * h * 2)
    fixed = (2 * h) * (8 * h) * 2 * 2 + 4 * b * h * 4 + (2 << 20)
    avail = max(budget_bytes // 2 - fixed, per_t)
    t = int(min(s, cap, max(1, avail // per_t)))
    while s % t:
        t -= 1
    return t


# ----------------------------------------------------------------------------
# Input projection:  gates = sum_i x_i @ W_i + b   (fwd|bwd fused on lanes, 8H)
# ----------------------------------------------------------------------------
def _proj_kernel(*refs, n_in):
    xs = refs[0:n_in]
    ws = refs[n_in:2 * n_in]
    b_ref = refs[2 * n_in]
    g_ref = refs[2 * n_in + 1]

    acc = None
    for x_ref, w_ref in zip(xs, ws):
        d = jnp.dot(x_ref[...].astype(jnp.bfloat16), w_ref[...],
                    preferred_element_type=jnp.float32)
        acc = d if acc is None else acc + d
    g_ref[...] = (acc + b_ref[...]).astype(g_ref.dtype)


def bilstm_input_proj(inputs, w_list, bias):
    """inputs: list of (N, D_i). Returns (N, 8H) bf16 gate pre-activations,
    lanes [0:4H] = forward gates, [4H:8H] = backward gates (PyTorch i|f|g|o)."""
    N = inputs[0].shape[0]
    G8 = w_list[0].shape[1]
    TN, N_pad = _row_tile(N)
    if N_pad != N:
        inputs = [jnp.pad(a, ((0, N_pad - N), (0, 0))) for a in inputs]
    n_in = len(inputs)

    in_specs = (
        [pl.BlockSpec((TN, a.shape[1]), lambda i: (i, 0)) for a in inputs]
        + [pl.BlockSpec(w.shape, lambda i: (0, 0)) for w in w_list]
        + [pl.BlockSpec((1, G8), lambda i: (0, 0))]
    )
    g = pl.pallas_call(
        functools.partial(_proj_kernel, n_in=n_in),
        out_shape=jax.ShapeDtypeStruct((N_pad, G8), jnp.bfloat16),
        grid=(N_pad // TN,),
        in_specs=in_specs,
        out_specs=pl.BlockSpec((TN, G8), lambda i: (i, 0)),
        compiler_params=pltpu.CompilerParams(
            dimension_semantics=("parallel",),
            vmem_limit_bytes=_VMEM_LIMIT),
    )(*inputs, *w_list, bias)
    return g[:N] if N_pad != N else g


# ----------------------------------------------------------------------------
# Fused bidirectional LSTM recurrence (block of T timesteps per grid step)
# ----------------------------------------------------------------------------
def _bilstm_kernel(gf_ref, gb_ref, whh_ref, of_ref, ob_ref,
                   h_s, cf_s, cb_s, *, hidden, t_block):
    k = pl.program_id(0)

    @pl.when(k == 0)
    def _():
        h_s[...] = jnp.zeros_like(h_s)
        cf_s[...] = jnp.zeros_like(cf_s)
        cb_s[...] = jnp.zeros_like(cb_s)

    H = hidden
    whh = whh_ref[...]          # (2H, 8H) bf16 block-diagonal, resident per block

    def cell(gates, c_prev):
        i = jax.nn.sigmoid(gates[:, 0 * H:1 * H])
        f = jax.nn.sigmoid(gates[:, 1 * H:2 * H])
        g = jnp.tanh(gates[:, 2 * H:3 * H])
        o = jax.nn.sigmoid(gates[:, 3 * H:4 * H])
        c_new = f * c_prev + i * g
        h_new = o * jnp.tanh(c_new)
        return h_new, c_new

    def body(j, carry):
        h2, cf, cb = carry                      # h2 = [hf | hb] (B, 2H) f32
        jr = t_block - 1 - j
        # Single fused matmul: [hf|hb] @ blockdiag(Whh_f, Whh_b) -> [hh_f|hh_b]
        hh = jnp.dot(h2.astype(jnp.bfloat16), whh,
                     preferred_element_type=jnp.float32)     # (B, 8H) f32
        gates_f = gf_ref[j].astype(jnp.float32) + hh[:, :4 * H]
        gates_b = gb_ref[jr].astype(jnp.float32) + hh[:, 4 * H:]
        hf, cf = cell(gates_f, cf)
        hb, cb = cell(gates_b, cb)
        of_ref[j] = hf.astype(of_ref.dtype)
        ob_ref[jr] = hb.astype(ob_ref.dtype)
        h2 = jnp.concatenate([hf, hb], axis=-1)
        return h2, cf, cb

    carry = (h_s[...], cf_s[...], cb_s[...])
    h2, cf, cb = jax.lax.fori_loop(0, t_block, body, carry, unroll=True)
    h_s[...] = h2
    cf_s[...] = cf
    cb_s[...] = cb


def bilstm_recurrence(gates, whh_packed):
    """gates: (S, B, 8H) bf16 pre-activations ([fwd | bwd] on lanes).
    whh_packed: (2H, 8H) bf16 block-diagonal.
    Returns (yf, yb): (S, B, H) bf16 hidden states in original time order."""
    S, B, G8 = gates.shape
    H = G8 // 8
    T = _time_block(S, B, H, _VMEM_LIMIT)
    nb = S // T

    yf, yb = pl.pallas_call(
        functools.partial(_bilstm_kernel, hidden=H, t_block=T),
        out_shape=(jax.ShapeDtypeStruct((S, B, H), jnp.bfloat16),
                   jax.ShapeDtypeStruct((S, B, H), jnp.bfloat16)),
        grid=(nb,),
        in_specs=[
            pl.BlockSpec((T, B, 4 * H), lambda k: (k, 0, 0)),           # fwd gates
            pl.BlockSpec((T, B, 4 * H), lambda k: (nb - 1 - k, 0, 1)),  # bwd gates
            pl.BlockSpec((2 * H, 8 * H), lambda k: (0, 0)),             # packed Whh
        ],
        out_specs=(
            pl.BlockSpec((T, B, H), lambda k: (k, 0, 0)),
            pl.BlockSpec((T, B, H), lambda k: (nb - 1 - k, 0, 0)),
        ),
        scratch_shapes=[pltpu.VMEM((B, 2 * H), jnp.float32),   # h = [hf|hb]
                        pltpu.VMEM((B, H), jnp.float32),       # cf
                        pltpu.VMEM((B, H), jnp.float32)],      # cb
        compiler_params=pltpu.CompilerParams(
            dimension_semantics=("arbitrary",),                # sequential recurrence
            vmem_limit_bytes=_VMEM_LIMIT),
    )(gates, gates, whh_packed)
    return yf, yb


# ----------------------------------------------------------------------------
# GELU (exact erf) + Linear on the split forward / backward halves
# ----------------------------------------------------------------------------
def _gelu_linear_kernel(yf_ref, yb_ref, wt_ref, wb_ref, b_ref, out_ref):
    inv_sqrt2 = 0.7071067811865476
    yf = yf_ref[...].astype(jnp.float32)
    yb = yb_ref[...].astype(jnp.float32)
    gf = 0.5 * yf * (1.0 + jax.lax.erf(yf * inv_sqrt2))
    gb = 0.5 * yb * (1.0 + jax.lax.erf(yb * inv_sqrt2))
    acc = jnp.dot(gf.astype(jnp.bfloat16), wt_ref[...],
                  preferred_element_type=jnp.float32)
    acc = acc + jnp.dot(gb.astype(jnp.bfloat16), wb_ref[...],
                        preferred_element_type=jnp.float32)
    out_ref[...] = (acc + b_ref[...]).astype(out_ref.dtype)


def gelu_linear(yf2d, yb2d, w_f, w_b, b):
    N, H = yf2d.shape
    O = w_f.shape[1]
    TN, N_pad = _row_tile(N)
    if N_pad != N:
        yf2d = jnp.pad(yf2d, ((0, N_pad - N), (0, 0)))
        yb2d = jnp.pad(yb2d, ((0, N_pad - N), (0, 0)))
    out = pl.pallas_call(
        _gelu_linear_kernel,
        out_shape=jax.ShapeDtypeStruct((N_pad, O), jnp.float32),
        grid=(N_pad // TN,),
        in_specs=[
            pl.BlockSpec((TN, H), lambda i: (i, 0)),
            pl.BlockSpec((TN, H), lambda i: (i, 0)),
            pl.BlockSpec((H, O), lambda i: (0, 0)),
            pl.BlockSpec((H, O), lambda i: (0, 0)),
            pl.BlockSpec((1, O), lambda i: (0, 0)),
        ],
        out_specs=pl.BlockSpec((TN, O), lambda i: (i, 0)),
        compiler_params=pltpu.CompilerParams(
            dimension_semantics=("parallel",),
            vmem_limit_bytes=_VMEM_LIMIT),
    )(yf2d, yb2d, w_f, w_b, b)
    return out[:N] if N_pad != N else out


# ----------------------------------------------------------------------------
# Full module forward (Pallas kernels + reshape-only glue)
# ----------------------------------------------------------------------------
def lstm_reg_forward(x, kp):
    S, B, _ = x.shape
    N = S * B
    acts = [x.reshape(N, -1)]                 # activation halves feeding layer 0
    for lp in kp["layers"]:
        H = lp["whh"].shape[0] // 2
        gates2d = bilstm_input_proj(acts, lp["wih"], lp["bias"])   # (N, 8H) bf16
        yf, yb = bilstm_recurrence(gates2d.reshape(S, B, 8 * H), lp["whh"])
        acts = [yf.reshape(N, H), yb.reshape(N, H)]
    out2d = gelu_linear(acts[0], acts[1],
                        kp["w_reg_f"], kp["w_reg_b"], kp["b_reg"])
    return out2d.reshape(S, B, -1)


# ----------------------------------------------------------------------------
# Deterministic parameter init (PyTorch nn.LSTM / nn.Linear conventions, f32)
# ----------------------------------------------------------------------------
def init_params(key, input_size, hidden, output_size):
    H = hidden
    k = 1.0 / math.sqrt(H)
    keys = iter(jax.random.split(key, 32))

    def u(shape, bound):
        return jax.random.uniform(next(keys), shape, jnp.float32, -bound, bound)

    params = {}
    layer_inputs = [input_size, 2 * H]
    for layer in range(2):
        for suffix in ("", "_rev"):
            I = layer_inputs[layer]
            w_ih = u((4 * H, I), k)            # PyTorch weight_ih_l{k}[_reverse]
            w_hh = u((4 * H, H), k)            # PyTorch weight_hh_l{k}[_reverse]
            b_ih = u((4 * H,), k)
            b_hh = u((4 * H,), k)
            params[f"w_ih_l{layer}{suffix}"] = jnp.transpose(w_ih)   # (I, 4H)
            params[f"w_hh_l{layer}{suffix}"] = jnp.transpose(w_hh)   # (H, 4H)
            params[f"b_l{layer}{suffix}"] = (b_ih + b_hh).reshape(1, 4 * H)

    kl = 1.0 / math.sqrt(2 * H)
    w_reg = u((output_size, 2 * H), kl)        # PyTorch nn.Linear weight
    b_reg = u((output_size,), kl)
    params["w_reg"] = jnp.transpose(w_reg)     # (2H, O)
    params["b_reg"] = b_reg.reshape(1, output_size)
    return params


def prepare_kernel_params(params, hidden):
    """Repack f32 PyTorch-style params into the kernel layout:
    direction-fused (I, 8H) bf16 input weights (split by row for layer 1),
    block-diagonal (2H, 8H) bf16 recurrent weights, bf16 split Linear weights."""
    H = hidden
    kp = {"layers": []}
    for layer in range(2):
        wih_f = params[f"w_ih_l{layer}"]                 # (I, 4H) f32
        wih_b = params[f"w_ih_l{layer}_rev"]
        whh_f = params[f"w_hh_l{layer}"]                 # (H, 4H) f32
        whh_b = params[f"w_hh_l{layer}_rev"]
        bias = jnp.concatenate([params[f"b_l{layer}"],
                                params[f"b_l{layer}_rev"]], axis=1)   # (1, 8H)
        w_fused = jnp.concatenate([wih_f, wih_b], axis=1)             # (I, 8H)
        if layer == 0:
            wih_list = [w_fused.astype(jnp.bfloat16)]
        else:   # layer-1 input is [fwd | bwd] of layer 0 -> split rows
            wih_list = [w_fused[:H].astype(jnp.bfloat16),
                        w_fused[H:].astype(jnp.bfloat16)]
        whh = jnp.zeros((2 * H, 8 * H), jnp.float32)
        whh = whh.at[:H, :4 * H].set(whh_f).at[H:, 4 * H:].set(whh_b)
        kp["layers"].append({"wih": wih_list, "bias": bias,
                             "whh": whh.astype(jnp.bfloat16)})
    w_reg = params["w_reg"]                              # (2H, O) f32
    kp["w_reg_f"] = w_reg[:H].astype(jnp.bfloat16)
    kp["w_reg_b"] = w_reg[H:].astype(jnp.bfloat16)
    kp["b_reg"] = params["b_reg"]
    return kp


# ----------------------------------------------------------------------------
# Pure-JAX f32 reference (exact PyTorch math) for a sanity check
# ----------------------------------------------------------------------------
def _ref_lstm_dir(x, w_ih_t, w_hh_t, b, reverse):
    S, B, _ = x.shape
    H = w_hh_t.shape[0]
    xs = x[::-1] if reverse else x

    def step(carry, xt):
        h, c = carry
        gates = xt @ w_ih_t + h @ w_hh_t + b
        i = jax.nn.sigmoid(gates[:, :H])
        f = jax.nn.sigmoid(gates[:, H:2 * H])
        g = jnp.tanh(gates[:, 2 * H:3 * H])
        o = jax.nn.sigmoid(gates[:, 3 * H:])
        c = f * c + i * g
        h = o * jnp.tanh(c)
        return (h, c), h

    init = (jnp.zeros((B, H), jnp.float32), jnp.zeros((B, H), jnp.float32))
    _, hs = jax.lax.scan(step, init, xs)
    return hs[::-1] if reverse else hs


def ref_forward(x, params):
    y = x
    for layer in range(2):
        hf = _ref_lstm_dir(y, params[f"w_ih_l{layer}"],
                           params[f"w_hh_l{layer}"],
                           params[f"b_l{layer}"], reverse=False)
        hb = _ref_lstm_dir(y, params[f"w_ih_l{layer}_rev"],
                           params[f"w_hh_l{layer}_rev"],
                           params[f"b_l{layer}_rev"], reverse=True)
        y = jnp.concatenate([hf, hb], axis=-1)
    S, B, H2 = y.shape
    flat = y.reshape(S * B, H2)
    g = 0.5 * flat * (1.0 + jax.lax.erf(flat / math.sqrt(2.0)))
    out = g @ params["w_reg"] + params["b_reg"]
    return out.reshape(S, B, -1)


if __name__ == "__main__":
    S, B, INPUT, HIDDEN, OUT = 8, 2, 4, 32, 2

    key = jax.random.PRNGKey(0)
    pkey, xkey = jax.random.split(key)
    params = init_params(pkey, INPUT, HIDDEN, OUT)
    kparams = prepare_kernel_params(params, HIDDEN)
    x = jax.random.normal(xkey, (S, B, INPUT), jnp.float32)

    forward = jax.jit(lstm_reg_forward)
    out = jax.block_until_ready(forward(x, kparams))
    assert out.shape == (S, B, OUT), out.shape

    ref = jax.block_until_ready(ref_forward(x, params))
    err = float(jnp.max(jnp.abs(out - ref)))
    # bf16 matmul operands + bf16 intermediate storage (f32 accumulation) ->
    # slightly looser tolerance than a pure-f32 pipeline.
    assert err < 6e-2, f"kernel vs reference mismatch: {err}"

    print("KERNEL_OK")
</pallas_src>

<mosaic_0001>
module attributes {stable_mosaic.version = 11 : i64} {
  func.func @_proj_kernel(%arg0: i32, %arg1: memref<16x4xf32, #tpu.memory_space<vmem>>, %arg2: memref<4x256xbf16, #tpu.memory_space<vmem>>, %arg3: memref<1x256xf32, #tpu.memory_space<vmem>>, %arg4: memref<16x256xbf16, #tpu.memory_space<vmem>>) attributes {dimension_semantics = [#tpu.dimension_semantics<parallel>], iteration_bounds = array<i64: 1>, scalar_prefetch = 0 : i64, scratch_operands = 0 : i64, tpu.core_type = #tpu.core_type<tc>, window_params = [{transform_indices = @transform_0, window_bounds = array<i64: 16, 4>}, {pipeline_mode = #tpu.pipeline_mode<synchronous>, transform_indices = @transform_1, window_bounds = array<i64: 4, 256>}, {pipeline_mode = #tpu.pipeline_mode<synchronous>, transform_indices = @transform_2, window_bounds = array<i64: 1, 256>}, {transform_indices = @transform_3, window_bounds = array<i64: 16, 256>}]} {
    %c0 = arith.constant 0 : index
    %c0_0 = arith.constant 0 : index
    %0 = vector.load %arg1[%c0, %c0_0] : memref<16x4xf32, #tpu.memory_space<vmem>>, vector<16x4xf32>
    %1 = arith.truncf %0 : vector<16x4xf32> to vector<16x4xbf16>
    %c0_1 = arith.constant 0 : index
    %c0_2 = arith.constant 0 : index
    %2 = vector.load %arg2[%c0_1, %c0_2] : memref<4x256xbf16, #tpu.memory_space<vmem>>, vector<4x256xbf16>
    %cst = arith.constant dense<0.000000e+00> : vector<16x256xf32>
    %3 = tpu.matmul %1, %2, %cst {dimension_numbers = #tpu.dot_dimension_numbers<[1], [0], [0], [1], [0, 0, 1, 1], [], []>} : vector<16x4xbf16>, vector<4x256xbf16>, vector<16x256xf32> -> vector<16x256xf32>
    %c0_3 = arith.constant 0 : index
    %c0_4 = arith.constant 0 : index
    %4 = vector.load %arg3[%c0_3, %c0_4] : memref<1x256xf32, #tpu.memory_space<vmem>>, vector<1x256xf32>
    %5 = vector.broadcast %4 : vector<1x256xf32> to vector<16x256xf32>
    %6 = arith.addf %3, %5 : vector<16x256xf32>
    %7 = arith.truncf %6 : vector<16x256xf32> to vector<16x256xbf16>
    %c0_5 = arith.constant 0 : index
    %c0_6 = arith.constant 0 : index
    %8 = vector.load %arg4[%c0_5, %c0_6] : memref<16x256xbf16, #tpu.memory_space<vmem>>, vector<16x256xbf16>
    tpu.vector_store %arg4[%c0_5, %c0_6], %7 {strides = array<i32>} : memref<16x256xbf16, #tpu.memory_space<vmem>>, vector<16x256xbf16>,
    return
  }
  func.func @transform_0(%arg0: i32) -> (i32, i32) {
    %c0_i32 = arith.constant 0 : i32
    %c0_i32_0 = arith.constant 0 : i32
    return %arg0, %c0_i32 : i32, i32
  }
  func.func @transform_1(%arg0: i32) -> (i32, i32) {
    %c0_i32 = arith.constant 0 : i32
    %c0_i32_0 = arith.constant 0 : i32
    %c0_i32_1 = arith.constant 0 : i32
    return %c0_i32, %c0_i32_0 : i32, i32
  }
  func.func @transform_2(%arg0: i32) -> (i32, i32) {
    %c0_i32 = arith.constant 0 : i32
    %c0_i32_0 = arith.constant 0 : i32
    %c0_i32_1 = arith.constant 0 : i32
    return %c0_i32, %c0_i32_0 : i32, i32
  }
  func.func @transform_3(%arg0: i32) -> (i32, i32) {
    %c0_i32 = arith.constant 0 : i32
    %c0_i32_0 = arith.constant 0 : i32
    return %arg0, %c0_i32 : i32, i32
  }
}

module attributes {stable_mosaic.version = 11 : i64} {
  func.func @_proj_kernel(%arg0: i32, %arg1: memref<16x32xbf16, #tpu.memory_space<vmem>>, %arg2: memref<16x32xbf16, #tpu.memory_space<vmem>>, %arg3: memref<32x256xbf16, #tpu.memory_space<vmem>>, %arg4: memref<32x256xbf16, #tpu.memory_space<vmem>>, %arg5: memref<1x256xf32, #tpu.memory_space<vmem>>, %arg6: memref<16x256xbf16, #tpu.memory_space<vmem>>) attributes {dimension_semantics = [#tpu.dimension_semantics<parallel>], iteration_bounds = array<i64: 1>, scalar_prefetch = 0 : i64, scratch_operands = 0 : i64, tpu.core_type = #tpu.core_type<tc>, window_params = [{transform_indices = @transform_0, window_bounds = array<i64: 16, 32>}, {transform_indices = @transform_1, window_bounds = array<i64: 16, 32>}, {pipeline_mode = #tpu.pipeline_mode<synchronous>, transform_indices = @transform_2, window_bounds = array<i64: 32, 256>}, {pipeline_mode = #tpu.pipeline_mode<synchronous>, transform_indices = @transform_3, window_bounds = array<i64: 32, 256>}, {pipeline_mode = #tpu.pipeline_mode<synchronous>, transform_indices = @transform_4, window_bounds = array<i64: 1, 256>}, {transform_indices = @transform_5, window_bounds = array<i64: 16, 256>}]} {
    %c0 = arith.constant 0 : index
    %c0_0 = arith.constant 0 : index
    %0 = vector.load %arg1[%c0, %c0_0] : memref<16x32xbf16, #tpu.memory_space<vmem>>, vector<16x32xbf16>
    %c0_1 = arith.constant 0 : index
    %c0_2 = arith.constant 0 : index
    %1 = vector.load %arg3[%c0_1, %c0_2] : memref<32x256xbf16, #tpu.memory_space<vmem>>, vector<32x256xbf16>
    %cst = arith.constant dense<0.000000e+00> : vector<16x256xf32>
    %2 = tpu.matmul %0, %1, %cst {dimension_numbers = #tpu.dot_dimension_numbers<[1], [0], [0], [1], [0, 0, 1, 1], [], []>} : vector<16x32xbf16>, vector<32x256xbf16>, vector<16x256xf32> -> vector<16x256xf32>
    %c0_3 = arith.constant 0 : index
    %c0_4 = arith.constant 0 : index
    %3 = vector.load %arg2[%c0_3, %c0_4] : memref<16x32xbf16, #tpu.memory_space<vmem>>, vector<16x32xbf16>
    %c0_5 = arith.constant 0 : index
    %c0_6 = arith.constant 0 : index
    %4 = vector.load %arg4[%c0_5, %c0_6] : memref<32x256xbf16, #tpu.memory_space<vmem>>, vector<32x256xbf16>
    %cst_7 = arith.constant dense<0.000000e+00> : vector<16x256xf32>
    %5 = tpu.matmul %3, %4, %cst_7 {dimension_numbers = #tpu.dot_dimension_numbers<[1], [0], [0], [1], [0, 0, 1, 1], [], []>} : vector<16x32xbf16>, vector<32x256xbf16>, vector<16x256xf32> -> vector<16x256xf32>
    %6 = arith.addf %2, %5 : vector<16x256xf32>
    %c0_8 = arith.constant 0 : index
    %c0_9 = arith.constant 0 : index
    %7 = vector.load %arg5[%c0_8, %c0_9] : memref<1x256xf32, #tpu.memory_space<vmem>>, vector<1x256xf32>
    %8 = vector.broadcast %7 : vector<1x256xf32> to vector<16x256xf32>
    %9 = arith.addf %6, %8 : vector<16x256xf32>
    %10 = arith.truncf %9 : vector<16x256xf32> to vector<16x256xbf16>
    %c0_10 = arith.constant 0 : index
    %c0_11 = arith.constant 0 : index
    %11 = vector.load %arg6[%c0_10, %c0_11] : memref<16x256xbf16, #tpu.memory_space<vmem>>, vector<16x256xbf16>
    tpu.vector_store %arg6[%c0_10, %c0_11], %10 {strides = array<i32>} : memref<16x256xbf16, #tpu.memory_space<vmem>>, vector<16x256xbf16>,
    return
  }
  func.func @transform_0(%arg0: i32) -> (i32, i32) {
    %c0_i32 = arith.constant 0 : i32
    %c0_i32_0 = arith.constant 0 : i32
    return %arg0, %c0_i32 : i32, i32
  }
  func.func @transform_1(%arg0: i32) -> (i32, i32) {
    %c0_i32 = arith.constant 0 : i32
    %c0_i32_0 = arith.constant 0 : i32
    return %arg0, %c0_i32 : i32, i32
  }
  func.func @transform_2(%arg0: i32) -> (i32, i32) {
    %c0_i32 = arith.constant 0 : i32
    %c0_i32_0 = arith.constant 0 : i32
    %c0_i32_1 = arith.constant 0 : i32
    return %c0_i32, %c0_i32_0 : i32, i32
  }
  func.func @transform_3(%arg0: i32) -> (i32, i32) {
    %c0_i32 = arith.constant 0 : i32
    %c0_i32_0 = arith.constant 0 : i32
    %c0_i32_1 = arith.constant 0 : i32
    return %c0_i32, %c0_i32_0 : i32, i32
  }
  func.func @transform_4(%arg0: i32) -> (i32, i32) {
    %c0_i32 = arith.constant 0 : i32
    %c0_i32_0 = arith.constant 0 : i32
    %c0_i32_1 = arith.constant 0 : i32
    return %c0_i32, %c0_i32_0 : i32, i32
  }
  func.func @transform_5(%arg0: i32) -> (i32, i32) {
    %c0_i32 = arith.constant 0 : i32
    %c0_i32_0 = arith.constant 0 : i32
    return %arg0, %c0_i32 : i32, i32
  }
}

module attributes {stable_mosaic.version = 11 : i64} {
  func.func @_bilstm_kernel(%arg0: i32, %arg1: memref<8x2x128xbf16, #tpu.memory_space<vmem>>, %arg2: memref<8x2x128xbf16, #tpu.memory_space<vmem>>, %arg3: memref<64x256xbf16, #tpu.memory_space<vmem>>, %arg4: memref<8x2x32xbf16, #tpu.memory_space<vmem>>, %arg5: memref<8x2x32xbf16, #tpu.memory_space<vmem>>, %arg6: memref<2x64xf32, #tpu.memory_space<vmem>>, %arg7: memref<2x32xf32, #tpu.memory_space<vmem>>, %arg8: memref<2x32xf32, #tpu.memory_space<vmem>>) attributes {dimension_semantics = [#tpu.dimension_semantics<arbitrary>], iteration_bounds = array<i64: 1>, scalar_prefetch = 0 : i64, scratch_operands = 3 : i64, tpu.core_type = #tpu.core_type<tc>, window_params = [{transform_indices = @transform_0, window_bounds = array<i64: 8, 2, 128>}, {transform_indices = @transform_1, window_bounds = array<i64: 8, 2, 128>}, {pipeline_mode = #tpu.pipeline_mode<synchronous>, transform_indices = @transform_2, window_bounds = array<i64: 64, 256>}, {transform_indices = @transform_3, window_bounds = array<i64: 8, 2, 32>}, {transform_indices = @transform_4, window_bounds = array<i64: 8, 2, 32>}]} {
    %c0_i32 = arith.constant 0 : i32
    %0 = arith.cmpi eq, %arg0, %c0_i32 : i32
    %1 = arith.extui %0 : i1 to i32
    %c0_i32_0 = arith.constant 0 : i32
    %2 = arith.cmpi ne, %1, %c0_i32_0 : i32
    scf.if %2 {
      %cst_142 = arith.constant 0.000000e+00 : f32
      %618 = vector.broadcast %cst_142 : f32 to vector<2x64xf32>
      %c0_143 = arith.constant 0 : index
      %c0_144 = arith.constant 0 : index
      %619 = vector.load %arg6[%c0_143, %c0_144] : memref<2x64xf32, #tpu.memory_space<vmem>>, vector<2x64xf32>
      tpu.vector_store %arg6[%c0_143, %c0_144], %618 {strides = array<i32>} : memref<2x64xf32, #tpu.memory_space<vmem>>, vector<2x64xf32>,
      %cst_145 = arith.constant 0.000000e+00 : f32
      %620 = vector.broadcast %cst_145 : f32 to vector<2x32xf32>
      %c0_146 = arith.constant 0 : index
      %c0_147 = arith.constant 0 : index
      %621 = vector.load %arg7[%c0_146, %c0_147] : memref<2x32xf32, #tpu.memory_space<vmem>>, vector<2x32xf32>
      tpu.vector_store %arg7[%c0_146, %c0_147], %620 {strides = array<i32>} : memref<2x32xf32, #tpu.memory_space<vmem>>, vector<2x32xf32>,
      %cst_148 = arith.constant 0.000000e+00 : f32
      %622 = vector.broadcast %cst_148 : f32 to vector<2x32xf32>
      %c0_149 = arith.constant 0 : index
      %c0_150 = arith.constant 0 : index
      %623 = vector.load %arg8[%c0_149, %c0_150] : memref<2x32xf32, #tpu.memory_space<vmem>>, vector<2x32xf32>
      tpu.vector_store %arg8[%c0_149, %c0_150], %622 {strides = array<i32>} : memref<2x32xf32, #tpu.memory_space<vmem>>, vector<2x32xf32>,
    } else {
    }
    %c0 = arith.constant 0 : index
    %c0_1 = arith.constant 0 : index
    %3 = vector.load %arg3[%c0, %c0_1] : memref<64x256xbf16, #tpu.memory_space<vmem>>, vector<64x256xbf16>
    %c0_2 = arith.constant 0 : index
    %c0_3 = arith.constant 0 : index
    %4 = vector.load %arg6[%c0_2, %c0_3] : memref<2x64xf32, #tpu.memory_space<vmem>>, vector<2x64xf32>
    %c0_4 = arith.constant 0 : index
    %c0_5 = arith.constant 0 : index
    %5 = vector.load %arg7[%c0_4, %c0_5] : memref<2x32xf32, #tpu.memory_space<vmem>>, vector<2x32xf32>
    %c0_6 = arith.constant 0 : index
    %c0_7 = arith.constant 0 : index
    %6 = vector.load %arg8[%c0_6, %c0_7] : memref<2x32xf32, #tpu.memory_space<vmem>>, vector<2x32xf32>
    %c0_i32_8 = arith.constant 0 : i32
    %c7_i32 = arith.constant 7 : i32
    %7 = arith.subi %c7_i32, %c0_i32_8 : i32
    %8 = arith.truncf %4 : vector<2x64xf32> to vector<2x64xbf16>
    %cst = arith.constant dense<0.000000e+00> : vector<2x256xf32>
    %9 = tpu.matmul %8, %3, %cst {dimension_numbers = #tpu.dot_dimension_numbers<[1], [0], [0], [1], [0, 0, 1, 1], [], []>} : vector<2x64xbf16>, vector<64x256xbf16>, vector<2x256xf32> -> vector<2x256xf32>
    %10 = arith.index_cast %c0_i32_8 : i32 to index
    %c0_9 = arith.constant 0 : index
    %c0_10 = arith.constant 0 : index
    %11 = vector.load %arg1[%10, %c0_9, %c0_10] : memref<8x2x128xbf16, #tpu.memory_space<vmem>>, vector<1x2x128xbf16>
    %12 = vector.shape_cast %11 : vector<1x2x128xbf16> to vector<2x128xbf16>
    %13 = arith.extf %12 : vector<2x128xbf16> to vector<2x128xf32>
    %14 = vector.extract_strided_slice %9 {offsets = [0, 0], sizes = [2, 128], strides = [1, 1]} : vector<2x256xf32> to vector<2x128xf32>
    %15 = arith.addf %13, %14 : vector<2x128xf32>
    %16 = arith.index_cast %7 : i32 to index
    %c0_11 = arith.constant 0 : index
    %c0_12 = arith.constant 0 : index
    %17 = vector.load %arg2[%16, %c0_11, %c0_12] : memref<8x2x128xbf16, #tpu.memory_space<vmem>>, vector<1x2x128xbf16>
    %18 = vector.shape_cast %17 : vector<1x2x128xbf16> to vector<2x128xbf16>
    %19 = arith.extf %18 : vector<2x128xbf16> to vector<2x128xf32>
    %20 = vector.extract_strided_slice %9 {offsets = [0, 128], sizes = [2, 128], strides = [1, 1]} : vector<2x256xf32> to vector<2x128xf32>
    %21 = arith.addf %19, %20 : vector<2x128xf32>
    %22 = vector.extract_strided_slice %15 {offsets = [0, 0], sizes = [2, 32], strides = [1, 1]} : vector<2x128xf32> to vector<2x32xf32>
    %23 = arith.negf %22 : vector<2x32xf32>
    %24 = math.exp %23 : vector<2x32xf32>
    %cst_13 = arith.constant 1.000000e+00 : f32
    %25 = vector.broadcast %cst_13 : f32 to vector<2x32xf32>
    %26 = arith.addf %25, %24 : vector<2x32xf32>
    %27 = arith.divf %25, %26 : vector<2x32xf32>
    %28 = vector.extract_strided_slice %15 {offsets = [0, 32], sizes = [2, 32], strides = [1, 1]} : vector<2x128xf32> to vector<2x32xf32>
    %29 = arith.negf %28 : vector<2x32xf32>
    %30 = math.exp %29 : vector<2x32xf32>
    %cst_14 = arith.constant 1.000000e+00 : f32
    %31 = vector.broadcast %cst_14 : f32 to vector<2x32xf32>
    %32 = arith.addf %31, %30 : vector<2x32xf32>
    %33 = arith.divf %31, %32 : vector<2x32xf32>
    %34 = vector.extract_strided_slice %15 {offsets = [0, 64], sizes = [2, 32], strides = [1, 1]} : vector<2x128xf32> to vector<2x32xf32>
    %35 = math.tanh %34 : vector<2x32xf32>
    %36 = vector.extract_strided_slice %15 {offsets = [0, 96], sizes = [2, 32], strides = [1, 1]} : vector<2x128xf32> to vector<2x32xf32>
    %37 = arith.negf %36 : vector<2x32xf32>
    %38 = math.exp %37 : vector<2x32xf32>
    %cst_15 = arith.constant 1.000000e+00 : f32
    %39 = vector.broadcast %cst_15 : f32 to vector<2x32xf32>
    %40 = arith.addf %39, %38 : vector<2x32xf32>
    %41 = arith.divf %39, %40 : vector<2x32xf32>
    %42 = arith.mulf %33, %5 : vector<2x32xf32>
    %43 = arith.mulf %27, %35 : vector<2x32xf32>
    %44 = arith.addf %42, %43 : vector<2x32xf32>
    %45 = math.tanh %44 : vector<2x32xf32>
    %46 = arith.mulf %41, %45 : vector<2x32xf32>
    %47 = vector.extract_strided_slice %21 {offsets = [0, 0], sizes = [2, 32], strides = [1, 1]} : vector<2x128xf32> to vector<2x32xf32>
    %48 = arith.negf %47 : vector<2x32xf32>
    %49 = math.exp %48 : vector<2x32xf32>
    %cst_16 = arith.constant 1.000000e+00 : f32
    %50 = vector.broadcast %cst_16 : f32 to vector<2x32xf32>
    %51 = arith.addf %50, %49 : vector<2x32xf32>
    %52 = arith.divf %50, %51 : vector<2x32xf32>
    %53 = vector.extract_strided_slice %21 {offsets = [0, 32], sizes = [2, 32], strides = [1, 1]} : vector<2x128xf32> to vector<2x32xf32>
    %54 = arith.negf %53 : vector<2x32xf32>
    %55 = math.exp %54 : vector<2x32xf32>
    %cst_17 = arith.constant 1.000000e+00 : f32
    %56 = vector.broadcast %cst_17 : f32 to vector<2x32xf32>
    %57 = arith.addf %56, %55 : vector<2x32xf32>
    %58 = arith.divf %56, %57 : vector<2x32xf32>
    %59 = vector.extract_strided_slice %21 {offsets = [0, 64], sizes = [2, 32], strides = [1, 1]} : vector<2x128xf32> to vector<2x32xf32>
    %60 = math.tanh %59 : vector<2x32xf32>
    %61 = vector.extract_strided_slice %21 {offsets = [0, 96], sizes = [2, 32], strides = [1, 1]} : vector<2x128xf32> to vector<2x32xf32>
    %62 = arith.negf %61 : vector<2x32xf32>
    %63 = math.exp %62 : vector<2x32xf32>
    %cst_18 = arith.constant 1.000000e+00 : f32
    %64 = vector.broadcast %cst_18 : f32 to vector<2x32xf32>
    %65 = arith.addf %64, %63 : vector<2x32xf32>
    %66 = arith.divf %64, %65 : vector<2x32xf32>
    %67 = arith.mulf %58, %6 : vector<2x32xf32>
    %68 = arith.mulf %52, %60 : vector<2x32xf32>
    %69 = arith.addf %67, %68 : vector<2x32xf32>
    %70 = math.tanh %69 : vector<2x32xf32>
    %71 = arith.mulf %66, %70 : vector<2x32xf32>
    %72 = arith.truncf %46 : vector<2x32xf32> to vector<2x32xbf16>
    %73 = arith.index_cast %c0_i32_8 : i32 to index
    %c0_19 = arith.constant 0 : index
    %c0_20 = arith.constant 0 : index
    %74 = vector.load %arg4[%73, %c0_19, %c0_20] : memref<8x2x32xbf16, #tpu.memory_space<vmem>>, vector<1x2x32xbf16>
    %75 = vector.shape_cast %74 : vector<1x2x32xbf16> to vector<2x32xbf16>
    %76 = vector.shape_cast %72 : vector<2x32xbf16> to vector<1x2x32xbf16>
    tpu.vector_store %arg4[%73, %c0_19, %c0_20], %76 {strides = array<i32>} : memref<8x2x32xbf16, #tpu.memory_space<vmem>>, vector<1x2x32xbf16>,
    %77 = arith.truncf %71 : vector<2x32xf32> to vector<2x32xbf16>
    %78 = arith.index_cast %7 : i32 to index
    %c0_21 = arith.constant 0 : index
    %c0_22 = arith.constant 0 : index
    %79 = vector.load %arg5[%78, %c0_21, %c0_22] : memref<8x2x32xbf16, #tpu.memory_space<vmem>>, vector<1x2x32xbf16>
    %80 = vector.shape_cast %79 : vector<1x2x32xbf16> to vector<2x32xbf16>
    %81 = vector.shape_cast %77 : vector<2x32xbf16> to vector<1x2x32xbf16>
    tpu.vector_store %arg5[%78, %c0_21, %c0_22], %81 {strides = array<i32>} : memref<8x2x32xbf16, #tpu.memory_space<vmem>>, vector<1x2x32xbf16>,
    %82 = tpu.concatenate %46, %71 in 1 : vector<2x32xf32>, vector<2x32xf32> -> vector<2x64xf32>
    %c1_i32 = arith.constant 1 : i32
    %c7_i32_23 = arith.constant 7 : i32
    %83 = arith.subi %c7_i32_23, %c1_i32 : i32
    %84 = arith.truncf %82 : vector<2x64xf32> to vector<2x64xbf16>
    %cst_24 = arith.constant dense<0.000000e+00> : vector<2x256xf32>
    %85 = tpu.matmul %84, %3, %cst_24 {dimension_numbers = #tpu.dot_dimension_numbers<[1], [0], [0], [1], [0, 0, 1, 1], [], []>} : vector<2x64xbf16>, vector<64x256xbf16>, vector<2x256xf32> -> vector<2x256xf32>
    %86 = arith.index_cast %c1_i32 : i32 to index
    %c0_25 = arith.constant 0 : index
    %c0_26 = arith.constant 0 : index
    %87 = vector.load %arg1[%86, %c0_25, %c0_26] : memref<8x2x128xbf16, #tpu.memory_space<vmem>>, vector<1x2x128xbf16>
    %88 = vector.shape_cast %87 : vector<1x2x128xbf16> to vector<2x128xbf16>
    %89 = arith.extf %88 : vector<2x128xbf16> to vector<2x128xf32>
    %90 = vector.extract_strided_slice %85 {offsets = [0, 0], sizes = [2, 128], strides = [1, 1]} : vector<2x256xf32> to vector<2x128xf32>
    %91 = arith.addf %89, %90 : vector<2x128xf32>
    %92 = arith.index_cast %83 : i32 to index
    %c0_27 = arith.constant 0 : index
    %c0_28 = arith.constant 0 : index
    %93 = vector.load %arg2[%92, %c0_27, %c0_28] : memref<8x2x128xbf16, #tpu.memory_space<vmem>>, vector<1x2x128xbf16>
    %94 = vector.shape_cast %93 : vector<1x2x128xbf16> to vector<2x128xbf16>
    %95 = arith.extf %94 : vector<2x128xbf16> to vector<2x128xf32>
    %96 = vector.extract_strided_slice %85 {offsets = [0, 128], sizes = [2, 128], strides = [1, 1]} : vector<2x256xf32> to vector<2x128xf32>
    %97 = arith.addf %95, %96 : vector<2x128xf32>
    %98 = vector.extract_strided_slice %91 {offsets = [0, 0], sizes = [2, 32], strides = [1, 1]} : vector<2x128xf32> to vector<2x32xf32>
    %99 = arith.negf %98 : vector<2x32xf32>
    %100 = math.exp %99 : vector<2x32xf32>
    %cst_29 = arith.constant 1.000000e+00 : f32
    %101 = vector.broadcast %cst_29 : f32 to vector<2x32xf32>
    %102 = arith.addf %101, %100 : vector<2x32xf32>
    %103 = arith.divf %101, %102 : vector<2x32xf32>
    %104 = vector.extract_strided_slice %91 {offsets = [0, 32], sizes = [2, 32], strides = [1, 1]} : vector<2x128xf32> to vector<2x32xf32>
    %105 = arith.negf %104 : vector<2x32xf32>
    %106 = math.exp %105 : vector<2x32xf32>
    %cst_30 = arith.constant 1.000000e+00 : f32
    %107 = vector.broadcast %cst_30 : f32 to vector<2x32xf32>
    %108 = arith.addf %107, %106 : vector<2x32xf32>
    %109 = arith.divf %107, %108 : vector<2x32xf32>
    %110 = vector.extract_strided_slice %91 {offsets = [0, 64], sizes = [2, 32], strides = [1, 1]} : vector<2x128xf32> to vector<2x32xf32>
    %111 = math.tanh %110 : vector<2x32xf32>
    %112 = vector.extract_strided_slice %91 {offsets = [0, 96], sizes = [2, 32], strides = [1, 1]} : vector<2x128xf32> to vector<2x32xf32>
    %113 = arith.negf %112 : vector<2x32xf32>
    %114 = math.exp %113 : vector<2x32xf32>
    %cst_31 = arith.constant 1.000000e+00 : f32
    %115 = vector.broadcast %cst_31 : f32 to vector<2x32xf32>
    %116 = arith.addf %115, %114 : vector<2x32xf32>
    %117 = arith.divf %115, %116 : vector<2x32xf32>
    %118 = arith.mulf %109, %44 : vector<2x32xf32>
    %119 = arith.mulf %103, %111 : vector<2x32xf32>
    %120 = arith.addf %118, %119 : vector<2x32xf32>
    %121 = math.tanh %120 : vector<2x32xf32>
    %122 = arith.mulf %117, %121 : vector<2x32xf32>
    %123 = vector.extract_strided_slice %97 {offsets = [0, 0], sizes = [2, 32], strides = [1, 1]} : vector<2x128xf32> to vector<2x32xf32>
    %124 = arith.negf %123 : vector<2x32xf32>
    %125 = math.exp %124 : vector<2x32xf32>
    %cst_32 = arith.constant 1.000000e+00 : f32
    %126 = vector.broadcast %cst_32 : f32 to vector<2x32xf32>
    %127 = arith.addf %126, %125 : vector<2x32xf32>
    %128 = arith.divf %126, %127 : vector<2x32xf32>
    %129 = vector.extract_strided_slice %97 {offsets = [0, 32], sizes = [2, 32], strides = [1, 1]} : vector<2x128xf32> to vector<2x32xf32>
    %130 = arith.negf %129 : vector<2x32xf32>
    %131 = math.exp %130 : vector<2x32xf32>
    %cst_33 = arith.constant 1.000000e+00 : f32
    %132 = vector.broadcast %cst_33 : f32 to vector<2x32xf32>
    %133 = arith.addf %132, %131 : vector<2x32xf32>
    %134 = arith.divf %132, %133 : vector<2x32xf32>
    %135 = vector.extract_strided_slice %97 {offsets = [0, 64], sizes = [2, 32], strides = [1, 1]} : vector<2x128xf32> to vector<2x32xf32>
    %136 = math.tanh %135 : vector<2x32xf32>
    %137 = vector.extract_strided_slice %97 {offsets = [0, 96], sizes = [2, 32], strides = [1, 1]} : vector<2x128xf32> to vector<2x32xf32>
    %138 = arith.negf %137 : vector<2x32xf32>
    %139 = math.exp %138 : vector<2x32xf32>
    %cst_34 = arith.constant 1.000000e+00 : f32
    %140 = vector.broadcast %cst_34 : f32 to vector<2x32xf32>
    %141 = arith.addf %140, %139 : vector<2x32xf32>
    %142 = arith.divf %140, %141 : vector<2x32xf32>
    %143 = arith.mulf %134, %69 : vector<2x32xf32>
    %144 = arith.mulf %128, %136 : vector<2x32xf32>
    %145 = arith.addf %143, %144 : vector<2x32xf32>
    %146 = math.tanh %145 : vector<2x32xf32>
    %147 = arith.mulf %142, %146 : vector<2x32xf32>
    %148 = arith.truncf %122 : vector<2x32xf32> to vector<2x32xbf16>
    %149 = arith.index_cast %c1_i32 : i32 to index
    %c0_35 = arith.constant 0 : index
    %c0_36 = arith.constant 0 : index
    %150 = vector.load %arg4[%149, %c0_35, %c0_36] : memref<8x2x32xbf16, #tpu.memory_space<vmem>>, vector<1x2x32xbf16>
    %151 = vector.shape_cast %150 : vector<1x2x32xbf16> to vector<2x32xbf16>
    %152 = vector.shape_cast %148 : vector<2x32xbf16> to vector<1x2x32xbf16>
    tpu.vector_store %arg4[%149, %c0_35, %c0_36], %152 {strides = array<i32>} : memref<8x2x32xbf16, #tpu.memory_space<vmem>>, vector<1x2x32xbf16>,
    %153 = arith.truncf %147 : vector<2x32xf32> to vector<2x32xbf16>
    %154 = arith.index_cast %83 : i32 to index
    %c0_37 = arith.constant 0 : index
    %c0_38 = arith.constant 0 : index
    %155 = vector.load %arg5[%154, %c0_37, %c0_38] : memref<8x2x32xbf16, #tpu.memory_space<vmem>>, vector<1x2x32xbf16>
    %156 = vector.shape_cast %155 : vector<1x2x32xbf16> to vector<2x32xbf16>
    %157 = vector.shape_cast %153 : vector<2x32xbf16> to vector<1x2x32xbf16>
    tpu.vector_store %arg5[%154, %c0_37, %c0_38], %157 {strides = array<i32>} : memref<8x2x32xbf16, #tpu.memory_space<vmem>>, vector<1x2x32xbf16>,
    %158 = tpu.concatenate %122, %147 in 1 : vector<2x32xf32>, vector<2x32xf32> -> vector<2x64xf32>
    %c2_i32 = arith.constant 2 : i32
    %c7_i32_39 = arith.constant 7 : i32
    %159 = arith.subi %c7_i32_39, %c2_i32 : i32
    %160 = arith.truncf %158 : vector<2x64xf32> to vector<2x64xbf16>
    %cst_40 = arith.constant dense<0.000000e+00> : vector<2x256xf32>
    %161 = tpu.matmul %160, %3, %cst_40 {dimension_numbers = #tpu.dot_dimension_numbers<[1], [0], [0], [1], [0, 0, 1, 1], [], []>} : vector<2x64xbf16>, vector<64x256xbf16>, vector<2x256xf32> -> vector<2x256xf32>
    %162 = arith.index_cast %c2_i32 : i32 to index
    %c0_41 = arith.constant 0 : index
    %c0_42 = arith.constant 0 : index
    %163 = vector.load %arg1[%162, %c0_41, %c0_42] : memref<8x2x128xbf16, #tpu.memory_space<vmem>>, vector<1x2x128xbf16>
    %164 = vector.shape_cast %163 : vector<1x2x128xbf16> to vector<2x128xbf16>
    %165 = arith.extf %164 : vector<2x128xbf16> to vector<2x128xf32>
    %166 = vector.extract_strided_slice %161 {offsets = [0, 0], sizes = [2, 128], strides = [1, 1]} : vector<2x256xf32> to vector<2x128xf32>
    %167 = arith.addf %165, %166 : vector<2x128xf32>
    %168 = arith.index_cast %159 : i32 to index
    %c0_43 = arith.constant 0 : index
    %c0_44 = arith.constant 0 : index
    %169 = vector.load %arg2[%168, %c0_43, %c0_44] : memref<8x2x128xbf16, #tpu.memory_space<vmem>>, vector<1x2x128xbf16>
    %170 = vector.shape_cast %169 : vector<1x2x128xbf16> to vector<2x128xbf16>
    %171 = arith.extf %170 : vector<2x128xbf16> to vector<2x128xf32>
    %172 = vector.extract_strided_slice %161 {offsets = [0, 128], sizes = [2, 128], strides = [1, 1]} : vector<2x256xf32> to vector<2x128xf32>
    %173 = arith.addf %171, %172 : vector<2x128xf32>
    %174 = vector.extract_strided_slice %167 {offsets = [0, 0], sizes = [2, 32], strides = [1, 1]} : vector<2x128xf32> to vector<2x32xf32>
    %175 = arith.negf %174 : vector<2x32xf32>
    %176 = math.exp %175 : vector<2x32xf32>
    %cst_45 = arith.constant 1.000000e+00 : f32
    %177 = vector.broadcast %cst_45 : f32 to vector<2x32xf32>
    %178 = arith.addf %177, %176 : vector<2x32xf32>
    %179 = arith.divf %177, %178 : vector<2x32xf32>
    %180 = vector.extract_strided_slice %167 {offsets = [0, 32], sizes = [2, 32], strides = [1, 1]} : vector<2x128xf32> to vector<2x32xf32>
    %181 = arith.negf %180 : vector<2x32xf32>
    %182 = math.exp %181 : vector<2x32xf32>
    %cst_46 = arith.constant 1.000000e+00 : f32
    %183 = vector.broadcast %cst_46 : f32 to vector<2x32xf32>
    %184 = arith.addf %183, %182 : vector<2x32xf32>
    %185 = arith.divf %183, %184 : vector<2x32xf32>
    %186 = vector.extract_strided_slice %167 {offsets = [0, 64], sizes = [2, 32], strides = [1, 1]} : vector<2x128xf32> to vector<2x32xf32>
    %187 = math.tanh %186 : vector<2x32xf32>
    %188 = vector.extract_strided_slice %167 {offsets = [0, 96], sizes = [2, 32], strides = [1, 1]} : vector<2x128xf32> to vector<2x32xf32>
    %189 = arith.negf %188 : vector<2x32xf32>
    %190 = math.exp %189 : vector<2x32xf32>
    %cst_47 = arith.constant 1.000000e+00 : f32
    %191 = vector.broadcast %cst_47 : f32 to vector<2x32xf32>
    %192 = arith.addf %191, %190 : vector<2x32xf32>
    %193 = arith.divf %191, %192 : vector<2x32xf32>
    %194 = arith.mulf %185, %120 : vector<2x32xf32>
    %195 = arith.mulf %179, %187 : vector<2x32xf32>
    %196 = arith.addf %194, %195 : vector<2x32xf32>
    %197 = math.tanh %196 : vector<2x32xf32>
    %198 = arith.mulf %193, %197 : vector<2x32xf32>
    %199 = vector.extract_strided_slice %173 {offsets = [0, 0], sizes = [2, 32], strides = [1, 1]} : vector<2x128xf32> to vector<2x32xf32>
    %200 = arith.negf %199 : vector<2x32xf32>
    %201 = math.exp %200 : vector<2x32xf32>
    %cst_48 = arith.constant 1.000000e+00 : f32
    %202 = vector.broadcast %cst_48 : f32 to vector<2x32xf32>
    %203 = arith.addf %202, %201 : vector<2x32xf32>
    %204 = arith.divf %202, %203 : vector<2x32xf32>
    %205 = vector.extract_strided_slice %173 {offsets = [0, 32], sizes = [2, 32], strides = [1, 1]} : vector<2x128xf32> to vector<2x32xf32>
    %206 = arith.negf %205 : vector<2x32xf32>
    %207 = math.exp %206 : vector<2x32xf32>
    %cst_49 = arith.constant 1.000000e+00 : f32
    %208 = vector.broadcast %cst_49 : f32 to vector<2x32xf32>
    %209 = arith.addf %208, %207 : vector<2x32xf32>
    %210 = arith.divf %208, %209 : vector<2x32xf32>
    %211 = vector.extract_strided_slice %173 {offsets = [0, 64], sizes = [2, 32], strides = [1, 1]} : vector<2x128xf32> to vector<2x32xf32>
    %212 = math.tanh %211 : vector<2x32xf32>
    %213 = vector.extract_strided_slice %173 {offsets = [0, 96], sizes = [2, 32], strides = [1, 1]} : vector<2x128xf32> to vector<2x32xf32>
    %214 = arith.negf %213 : vector<2x32xf32>
    %215 = math.exp %214 : vector<2x32xf32>
    %cst_50 = arith.constant 1.000000e+00 : f32
    %216 = vector.broadcast %cst_50 : f32 to vector<2x32xf32>
    %217 = arith.addf %216, %215 : vector<2x32xf32>
    %218 = arith.divf %216, %217 : vector<2x32xf32>
    %219 = arith.mulf %210, %145 : vector<2x32xf32>
    %220 = arith.mulf %204, %212 : vector<2x32xf32>
    %221 = arith.addf %219, %220 : vector<2x32xf32>
    %222 = math.tanh %221 : vector<2x32xf32>
    %223 = arith.mulf %218, %222 : vector<2x32xf32>
    %224 = arith.truncf %198 : vector<2x32xf32> to vector<2x32xbf16>
    %225 = arith.index_cast %c2_i32 : i32 to index
    %c0_51 = arith.constant 0 : index
    %c0_52 = arith.constant 0 : index
    %226 = vector.load %arg4[%225, %c0_51, %c0_52] : memref<8x2x32xbf16, #tpu.memory_space<vmem>>, vector<1x2x32xbf16>
    %227 = vector.shape_cast %226 : vector<1x2x32xbf16> to vector<2x32xbf16>
    %228 = vector.shape_cast %224 : vector<2x32xbf16> to vector<1x2x32xbf16>
    tpu.vector_store %arg4[%225, %c0_51, %c0_52], %228 {strides = array<i32>} : memref<8x2x32xbf16, #tpu.memory_space<vmem>>, vector<1x2x32xbf16>,
    %229 = arith.truncf %223 : vector<2x32xf32> to vector<2x32xbf16>
    %230 = arith.index_cast %159 : i32 to index
    %c0_53 = arith.constant 0 : index
    %c0_54 = arith.constant 0 : index
    %231 = vector.load %arg5[%230, %c0_53, %c0_54] : memref<8x2x32xbf16, #tpu.memory_space<vmem>>, vector<1x2x32xbf16>
    %232 = vector.shape_cast %231 : vector<1x2x32xbf16> to vector<2x32xbf16>
    %233 = vector.shape_cast %229 : vector<2x32xbf16> to vector<1x2x32xbf16>
    tpu.vector_store %arg5[%230, %c0_53, %c0_54], %233 {strides = array<i32>} : memref<8x2x32xbf16, #tpu.memory_space<vmem>>, vector<1x2x32xbf16>,
    %234 = tpu.concatenate %198, %223 in 1 : vector<2x32xf32>, vector<2x32xf32> -> vector<2x64xf32>
    %c3_i32 = arith.constant 3 : i32
    %c7_i32_55 = arith.constant 7 : i32
    %235 = arith.subi %c7_i32_55, %c3_i32 : i32
    %236 = arith.truncf %234 : vector<2x64xf32> to vector<2x64xbf16>
    %cst_56 = arith.constant dense<0.000000e+00> : vector<2x256xf32>
    %237 = tpu.matmul %236, %3, %cst_56 {dimension_numbers = #tpu.dot_dimension_numbers<[1], [0], [0], [1], [0, 0, 1, 1], [], []>} : vector<2x64xbf16>, vector<64x256xbf16>, vector<2x256xf32> -> vector<2x256xf32>
    %238 = arith.index_cast %c3_i32 : i32 to index
    %c0_57 = arith.constant 0 : index
    %c0_58 = arith.constant 0 : index
    %239 = vector.load %arg1[%238, %c0_57, %c0_58] : memref<8x2x128xbf16, #tpu.memory_space<vmem>>, vector<1x2x128xbf16>
    %240 = vector.shape_cast %239 : vector<1x2x128xbf16> to vector<2x128xbf16>
    %241 = arith.extf %240 : vector<2x128xbf16> to vector<2x128xf32>
    %242 = vector.extract_strided_slice %237 {offsets = [0, 0], sizes = [2, 128], strides = [1, 1]} : vector<2x256xf32> to vector<2x128xf32>
    %243 = arith.addf %241, %242 : vector<2x128xf32>
    %244 = arith.index_cast %235 : i32 to index
    %c0_59 = arith.constant 0 : index
    %c0_60 = arith.constant 0 : index
    %245 = vector.load %arg2[%244, %c0_59, %c0_60] : memref<8x2x128xbf16, #tpu.memory_space<vmem>>, vector<1x2x128xbf16>
    %246 = vector.shape_cast %245 : vector<1x2x128xbf16> to vector<2x128xbf16>
    %247 = arith.extf %246 : vector<2x128xbf16> to vector<2x128xf32>
    %248 = vector.extract_strided_slice %237 {offsets = [0, 128], sizes = [2, 128], strides = [1, 1]} : vector<2x256xf32> to vector<2x128xf32>
    %249 = arith.addf %247, %248 : vector<2x128xf32>
    %250 = vector.extract_strided_slice %243 {offsets = [0, 0], sizes = [2, 32], strides = [1, 1]} : vector<2x128xf32> to vector<2x32xf32>
    %251 = arith.negf %250 : vector<2x32xf32>
    %252 = math.exp %251 : vector<2x32xf32>
    %cst_61 = arith.constant 1.000000e+00 : f32
    %253 = vector.broadcast %cst_61 : f32 to vector<2x32xf32>
    %254 = arith.addf %253, %252 : vector<2x32xf32>
    %255 = arith.divf %253, %254 : vector<2x32xf32>
    %256 = vector.extract_strided_slice %243 {offsets = [0, 32], sizes = [2, 32], strides = [1, 1]} : vector<2x128xf32> to vector<2x32xf32>
    %257 = arith.negf %256 : vector<2x32xf32>
    %258 = math.exp %257 : vector<2x32xf32>
    %cst_62 = arith.constant 1.000000e+00 : f32
    %259 = vector.broadcast %cst_62 : f32 to vector<2x32xf32>
    %260 = arith.addf %259, %258 : vector<2x32xf32>
    %261 = arith.divf %259, %260 : vector<2x32xf32>
    %262 = vector.extract_strided_slice %243 {offsets = [0, 64], sizes = [2, 32], strides = [1, 1]} : vector<2x128xf32> to vector<2x32xf32>
    %263 = math.tanh %262 : vector<2x32xf32>
    %264 = vector.extract_strided_slice %243 {offsets = [0, 96], sizes = [2, 32], strides = [1, 1]} : vector<2x128xf32> to vector<2x32xf32>
    %265 = arith.negf %264 : vector<2x32xf32>
    %266 = math.exp %265 : vector<2x32xf32>
    %cst_63 = arith.constant 1.000000e+00 : f32
    %267 = vector.broadcast %cst_63 : f32 to vector<2x32xf32>
    %268 = arith.addf %267, %266 : vector<2x32xf32>
    %269 = arith.divf %267, %268 : vector<2x32xf32>
    %270 = arith.mulf %261, %196 : vector<2x32xf32>
    %271 = arith.mulf %255, %263 : vector<2x32xf32>
    %272 = arith.addf %270, %271 : vector<2x32xf32>
    %273 = math.tanh %272 : vector<2x32xf32>
    %274 = arith.mulf %269, %273 : vector<2x32xf32>
    %275 = vector.extract_strided_slice %249 {offsets = [0, 0], sizes = [2, 32], strides = [1, 1]} : vector<2x128xf32> to vector<2x32xf32>
    %276 = arith.negf %275 : vector<2x32xf32>
    %277 = math.exp %276 : vector<2x32xf32>
    %cst_64 = arith.constant 1.000000e+00 : f32
    %278 = vector.broadcast %cst_64 : f32 to vector<2x32xf32>
    %279 = arith.addf %278, %277 : vector<2x32xf32>
    %280 = arith.divf %278, %279 : vector<2x32xf32>
    %281 = vector.extract_strided_slice %249 {offsets = [0, 32], sizes = [2, 32], strides = [1, 1]} : vector<2x128xf32> to vector<2x32xf32>
    %282 = arith.negf %281 : vector<2x32xf32>
    %283 = math.exp %282 : vector<2x32xf32>
    %cst_65 = arith.constant 1.000000e+00 : f32
    %284 = vector.broadcast %cst_65 : f32 to vector<2x32xf32>
    %285 = arith.addf %284, %283 : vector<2x32xf32>
    %286 = arith.divf %284, %285 : vector<2x32xf32>
    %287 = vector.extract_strided_slice %249 {offsets = [0, 64], sizes = [2, 32], strides = [1, 1]} : vector<2x128xf32> to vector<2x32xf32>
    %288 = math.tanh %287 : vector<2x32xf32>
    %289 = vector.extract_strided_slice %249 {offsets = [0, 96], sizes = [2, 32], strides = [1, 1]} : vector<2x128xf32> to vector<2x32xf32>
    %290 = arith.negf %289 : vector<2x32xf32>
    %291 = math.exp %290 : vector<2x32xf32>
    %cst_66 = arith.constant 1.000000e+00 : f32
    %292 = vector.broadcast %cst_66 : f32 to vector<2x32xf32>
    %293 = arith.addf %292, %291 : vector<2x32xf32>
    %294 = arith.divf %292, %293 : vector<2x32xf32>
    %295 = arith.mulf %286, %221 : vector<2x32xf32>
    %296 = arith.mulf %280, %288 : vector<2x32xf32>
    %297 = arith.addf %295, %296 : vector<2x32xf32>
    %298 = math.tanh %297 : vector<2x32xf32>
    %299 = arith.mulf %294, %298 : vector<2x32xf32>
    %300 = arith.truncf %274 : vector<2x32xf32> to vector<2x32xbf16>
    %301 = arith.index_cast %c3_i32 : i32 to index
    %c0_67 = arith.constant 0 : index
    %c0_68 = arith.constant 0 : index
    %302 = vector.load %arg4[%301, %c0_67, %c0_68] : memref<8x2x32xbf16, #tpu.memory_space<vmem>>, vector<1x2x32xbf16>
    %303 = vector.shape_cast %302 : vector<1x2x32xbf16> to vector<2x32xbf16>
    %304 = vector.shape_cast %300 : vector<2x32xbf16> to vector<1x2x32xbf16>
    tpu.vector_store %arg4[%301, %c0_67, %c0_68], %304 {strides = array<i32>} : memref<8x2x32xbf16, #tpu.memory_space<vmem>>, vector<1x2x32xbf16>,
    %305 = arith.truncf %299 : vector<2x32xf32> to vector<2x32xbf16>
    %306 = arith.index_cast %235 : i32 to index
    %c0_69 = arith.constant 0 : index
    %c0_70 = arith.constant 0 : index
    %307 = vector.load %arg5[%306, %c0_69, %c0_70] : memref<8x2x32xbf16, #tpu.memory_space<vmem>>, vector<1x2x32xbf16>
    %308 = vector.shape_cast %307 : vector<1x2x32xbf16> to vector<2x32xbf16>
    %309 = vector.shape_cast %305 : vector<2x32xbf16> to vector<1x2x32xbf16>
    tpu.vector_store %arg5[%306, %c0_69, %c0_70], %309 {strides = array<i32>} : memref<8x2x32xbf16, #tpu.memory_space<vmem>>, vector<1x2x32xbf16>,
    %310 = tpu.concatenate %274, %299 in 1 : vector<2x32xf32>, vector<2x32xf32> -> vector<2x64xf32>
    %c4_i32 = arith.constant 4 : i32
    %c7_i32_71 = arith.constant 7 : i32
    %311 = arith.subi %c7_i32_71, %c4_i32 : i32
    %312 = arith.truncf %310 : vector<2x64xf32> to vector<2x64xbf16>
    %cst_72 = arith.constant dense<0.000000e+00> : vector<2x256xf32>
    %313 = tpu.matmul %312, %3, %cst_72 {dimension_numbers = #tpu.dot_dimension_numbers<[1], [0], [0], [1], [0, 0, 1, 1], [], []>} : vector<2x64xbf16>, vector<64x256xbf16>, vector<2x256xf32> -> vector<2x256xf32>
    %314 = arith.index_cast %c4_i32 : i32 to index
    %c0_73 = arith.constant 0 : index
    %c0_74 = arith.constant 0 : index
    %315 = vector.load %arg1[%314, %c0_73, %c0_74] : memref<8x2x128xbf16, #tpu.memory_space<vmem>>, vector<1x2x128xbf16>
    %316 = vector.shape_cast %315 : vector<1x2x128xbf16> to vector<2x128xbf16>
    %317 = arith.extf %316 : vector<2x128xbf16> to vector<2x128xf32>
    %318 = vector.extract_strided_slice %313 {offsets = [0, 0], sizes = [2, 128], strides = [1, 1]} : vector<2x256xf32> to vector<2x128xf32>
    %319 = arith.addf %317, %318 : vector<2x128xf32>
    %320 = arith.index_cast %311 : i32 to index
    %c0_75 = arith.constant 0 : index
    %c0_76 = arith.constant 0 : index
    %321 = vector.load %arg2[%320, %c0_75, %c0_76] : memref<8x2x128xbf16, #tpu.memory_space<vmem>>, vector<1x2x128xbf16>
    %322 = vector.shape_cast %321 : vector<1x2x128xbf16> to vector<2x128xbf16>
    %323 = arith.extf %322 : vector<2x128xbf16> to vector<2x128xf32>
    %324 = vector.extract_strided_slice %313 {offsets = [0, 128], sizes = [2, 128], strides = [1, 1]} : vector<2x256xf32> to vector<2x128xf32>
    %325 = arith.addf %323, %324 : vector<2x128xf32>
    %326 = vector.extract_strided_slice %319 {offsets = [0, 0], sizes = [2, 32], strides = [1, 1]} : vector<2x128xf32> to vector<2x32xf32>
    %327 = arith.negf %326 : vector<2x32xf32>
    %328 = math.exp %327 : vector<2x32xf32>
    %cst_77 = arith.constant 1.000000e+00 : f32
    %329 = vector.broadcast %cst_77 : f32 to vector<2x32xf32>
    %330 = arith.addf %329, %328 : vector<2x32xf32>
    %331 = arith.divf %329, %330 : vector<2x32xf32>
    %332 = vector.extract_strided_slice %319 {offsets = [0, 32], sizes = [2, 32], strides = [1, 1]} : vector<2x128xf32> to vector<2x32xf32>
    %333 = arith.negf %332 : vector<2x32xf32>
    %334 = math.exp %333 : vector<2x32xf32>
    %cst_78 = arith.constant 1.000000e+00 : f32
    %335 = vector.broadcast %cst_78 : f32 to vector<2x32xf32>
    %336 = arith.addf %335, %334 : vector<2x32xf32>
    %337 = arith.divf %335, %336 : vector<2x32xf32>
    %338 = vector.extract_strided_slice %319 {offsets = [0, 64], sizes = [2, 32], strides = [1, 1]} : vector<2x128xf32> to vector<2x32xf32>
    %339 = math.tanh %338 : vector<2x32xf32>
    %340 = vector.extract_strided_slice %319 {offsets = [0, 96], sizes = [2, 32], strides = [1, 1]} : vector<2x128xf32> to vector<2x32xf32>
    %341 = arith.negf %340 : vector<2x32xf32>
    %342 = math.exp %341 : vector<2x32xf32>
    %cst_79 = arith.constant 1.000000e+00 : f32
    %343 = vector.broadcast %cst_79 : f32 to vector<2x32xf32>
    %344 = arith.addf %343, %342 : vector<2x32xf32>
    %345 = arith.divf %343, %344 : vector<2x32xf32>
    %346 = arith.mulf %337, %272 : vector<2x32xf32>
    %347 = arith.mulf %331, %339 : vector<2x32xf32>
    %348 = arith.addf %346, %347 : vector<2x32xf32>
    %349 = math.tanh %348 : vector<2x32xf32>
    %350 = arith.mulf %345, %349 : vector<2x32xf32>
    %351 = vector.extract_strided_slice %325 {offsets = [0, 0], sizes = [2, 32], strides = [1, 1]} : vector<2x128xf32> to vector<2x32xf32>
    %352 = arith.negf %351 : vector<2x32xf32>
    %353 = math.exp %352 : vector<2x32xf32>
    %cst_80 = arith.constant 1.000000e+00 : f32
    %354 = vector.broadcast %cst_80 : f32 to vector<2x32xf32>
    %355 = arith.addf %354, %353 : vector<2x32xf32>
    %356 = arith.divf %354, %355 : vector<2x32xf32>
    %357 = vector.extract_strided_slice %325 {offsets = [0, 32], sizes = [2, 32], strides = [1, 1]} : vector<2x128xf32> to vector<2x32xf32>
    %358 = arith.negf %357 : vector<2x32xf32>
    %359 = math.exp %358 : vector<2x32xf32>
    %cst_81 = arith.constant 1.000000e+00 : f32
    %360 = vector.broadcast %cst_81 : f32 to vector<2x32xf32>
    %361 = arith.addf %360, %359 : vector<2x32xf32>
    %362 = arith.divf %360, %361 : vector<2x32xf32>
    %363 = vector.extract_strided_slice %325 {offsets = [0, 64], sizes = [2, 32], strides = [1, 1]} : vector<2x128xf32> to vector<2x32xf32>
    %364 = math.tanh %363 : vector<2x32xf32>
    %365 = vector.extract_strided_slice %325 {offsets = [0, 96], sizes = [2, 32], strides = [1, 1]} : vector<2x128xf32> to vector<2x32xf32>
    %366 = arith.negf %365 : vector<2x32xf32>
    %367 = math.exp %366 : vector<2x32xf32>
    %cst_82 = arith.constant 1.000000e+00 : f32
    %368 = vector.broadcast %cst_82 : f32 to vector<2x32xf32>
    %369 = arith.addf %368, %367 : vector<2x32xf32>
    %370 = arith.divf %368, %369 : vector<2x32xf32>
    %371 = arith.mulf %362, %297 : vector<2x32xf32>
    %372 = arith.mulf %356, %364 : vector<2x32xf32>
    %373 = arith.addf %371, %372 : vector<2x32xf32>
    %374 = math.tanh %373 : vector<2x32xf32>
    %375 = arith.mulf %370, %374 : vector<2x32xf32>
    %376 = arith.truncf %350 : vector<2x32xf32> to vector<2x32xbf16>
    %377 = arith.index_cast %c4_i32 : i32 to index
    %c0_83 = arith.constant 0 : index
    %c0_84 = arith.constant 0 : index
    %378 = vector.load %arg4[%377, %c0_83, %c0_84] : memref<8x2x32xbf16, #tpu.memory_space<vmem>>, vector<1x2x32xbf16>
    %379 = vector.shape_cast %378 : vector<1x2x32xbf16> to vector<2x32xbf16>
    %380 = vector.shape_cast %376 : vector<2x32xbf16> to vector<1x2x32xbf16>
    tpu.vector_store %arg4[%377, %c0_83, %c0_84], %380 {strides = array<i32>} : memref<8x2x32xbf16, #tpu.memory_space<vmem>>, vector<1x2x32xbf16>,
    %381 = arith.truncf %375 : vector<2x32xf32> to vector<2x32xbf16>
    %382 = arith.index_cast %311 : i32 to index
    %c0_85 = arith.constant 0 : index
    %c0_86 = arith.constant 0 : index
    %383 = vector.load %arg5[%382, %c0_85, %c0_86] : memref<8x2x32xbf16, #tpu.memory_space<vmem>>, vector<1x2x32xbf16>
    %384 = vector.shape_cast %383 : vector<1x2x32xbf16> to vector<2x32xbf16>
    %385 = vector.shape_cast %381 : vector<2x32xbf16> to vector<1x2x32xbf16>
    tpu.vector_store %arg5[%382, %c0_85, %c0_86], %385 {strides = array<i32>} : memref<8x2x32xbf16, #tpu.memory_space<vmem>>, vector<1x2x32xbf16>,
    %386 = tpu.concatenate %350, %375 in 1 : vector<2x32xf32>, vector<2x32xf32> -> vector<2x64xf32>
    %c5_i32 = arith.constant 5 : i32
    %c7_i32_87 = arith.constant 7 : i32
    %387 = arith.subi %c7_i32_87, %c5_i32 : i32
    %388 = arith.truncf %386 : vector<2x64xf32> to vector<2x64xbf16>
    %cst_88 = arith.constant dense<0.000000e+00> : vector<2x256xf32>
    %389 = tpu.matmul %388, %3, %cst_88 {dimension_numbers = #tpu.dot_dimension_numbers<[1], [0], [0], [1], [0, 0, 1, 1], [], []>} : vector<2x64xbf16>, vector<64x256xbf16>, vector<2x256xf32> -> vector<2x256xf32>
    %390 = arith.index_cast %c5_i32 : i32 to index
    %c0_89 = arith.constant 0 : index
    %c0_90 = arith.constant 0 : index
    %391 = vector.load %arg1[%390, %c0_89, %c0_90] : memref<8x2x128xbf16, #tpu.memory_space<vmem>>, vector<1x2x128xbf16>
    %392 = vector.shape_cast %391 : vector<1x2x128xbf16> to vector<2x128xbf16>
    %393 = arith.extf %392 : vector<2x128xbf16> to vector<2x128xf32>
    %394 = vector.extract_strided_slice %389 {offsets = [0, 0], sizes = [2, 128], strides = [1, 1]} : vector<2x256xf32> to vector<2x128xf32>
    %395 = arith.addf %393, %394 : vector<2x128xf32>
    %396 = arith.index_cast %387 : i32 to index
    %c0_91 = arith.constant 0 : index
    %c0_92 = arith.constant 0 : index
    %397 = vector.load %arg2[%396, %c0_91, %c0_92] : memref<8x2x128xbf16, #tpu.memory_space<vmem>>, vector<1x2x128xbf16>
    %398 = vector.shape_cast %397 : vector<1x2x128xbf16> to vector<2x128xbf16>
    %399 = arith.extf %398 : vector<2x128xbf16> to vector<2x128xf32>
    %400 = vector.extract_strided_slice %389 {offsets = [0, 128], sizes = [2, 128], strides = [1, 1]} : vector<2x256xf32> to vector<2x128xf32>
    %401 = arith.addf %399, %400 : vector<2x128xf32>
    %402 = vector.extract_strided_slice %395 {offsets = [0, 0], sizes = [2, 32], strides = [1, 1]} : vector<2x128xf32> to vector<2x32xf32>
    %403 = arith.negf %402 : vector<2x32xf32>
    %404 = math.exp %403 : vector<2x32xf32>
    %cst_93 = arith.constant 1.000000e+00 : f32
    %405 = vector.broadcast %cst_93 : f32 to vector<2x32xf32>
    %406 = arith.addf %405, %404 : vector<2x32xf32>
    %407 = arith.divf %405, %406 : vector<2x32xf32>
    %408 = vector.extract_strided_slice %395 {offsets = [0, 32], sizes = [2, 32], strides = [1, 1]} : vector<2x128xf32> to vector<2x32xf32>
    %409 = arith.negf %408 : vector<2x32xf32>
    %410 = math.exp %409 : vector<2x32xf32>
    %cst_94 = arith.constant 1.000000e+00 : f32
    %411 = vector.broadcast %cst_94 : f32 to vector<2x32xf32>
    %412 = arith.addf %411, %410 : vector<2x32xf32>
    %413 = arith.divf %411, %412 : vector<2x32xf32>
    %414 = vector.extract_strided_slice %395 {offsets = [0, 64], sizes = [2, 32], strides = [1, 1]} : vector<2x128xf32> to vector<2x32xf32>
    %415 = math.tanh %414 : vector<2x32xf32>
    %416 = vector.extract_strided_slice %395 {offsets = [0, 96], sizes = [2, 32], strides = [1, 1]} : vector<2x128xf32> to vector<2x32xf32>
    %417 = arith.negf %416 : vector<2x32xf32>
    %418 = math.exp %417 : vector<2x32xf32>
    %cst_95 = arith.constant 1.000000e+00 : f32
    %419 = vector.broadcast %cst_95 : f32 to vector<2x32xf32>
    %420 = arith.addf %419, %418 : vector<2x32xf32>
    %421 = arith.divf %419, %420 : vector<2x32xf32>
    %422 = arith.mulf %413, %348 : vector<2x32xf32>
    %423 = arith.mulf %407, %415 : vector<2x32xf32>
    %424 = arith.addf %422, %423 : vector<2x32xf32>
    %425 = math.tanh %424 : vector<2x32xf32>
    %426 = arith.mulf %421, %425 : vector<2x32xf32>
    %427 = vector.extract_strided_slice %401 {offsets = [0, 0], sizes = [2, 32], strides = [1, 1]} : vector<2x128xf32> to vector<2x32xf32>
    %428 = arith.negf %427 : vector<2x32xf32>
    %429 = math.exp %428 : vector<2x32xf32>
    %cst_96 = arith.constant 1.000000e+00 : f32
    %430 = vector.broadcast %cst_96 : f32 to vector<2x32xf32>
    %431 = arith.addf %430, %429 : vector<2x32xf32>
    %432 = arith.divf %430, %431 : vector<2x32xf32>
    %433 = vector.extract_strided_slice %401 {offsets = [0, 32], sizes = [2, 32], strides = [1, 1]} : vector<2x128xf32> to vector<2x32xf32>
    %434 = arith.negf %433 : vector<2x32xf32>
    %435 = math.exp %434 : vector<2x32xf32>
    %cst_97 = arith.constant 1.000000e+00 : f32
    %436 = vector.broadcast %cst_97 : f32 to vector<2x32xf32>
    %437 = arith.addf %436, %435 : vector<2x32xf32>
    %438 = arith.divf %436, %437 : vector<2x32xf32>
    %439 = vector.extract_strided_slice %401 {offsets = [0, 64], sizes = [2, 32], strides = [1, 1]} : vector<2x128xf32> to vector<2x32xf32>
    %440 = math.tanh %439 : vector<2x32xf32>
    %441 = vector.extract_strided_slice %401 {offsets = [0, 96], sizes = [2, 32], strides = [1, 1]} : vector<2x128xf32> to vector<2x32xf32>
    %442 = arith.negf %441 : vector<2x32xf32>
    %443 = math.exp %442 : vector<2x32xf32>
    %cst_98 = arith.constant 1.000000e+00 : f32
    %444 = vector.broadcast %cst_98 : f32 to vector<2x32xf32>
    %445 = arith.addf %444, %443 : vector<2x32xf32>
    %446 = arith.divf %444, %445 : vector<2x32xf32>
    %447 = arith.mulf %438, %373 : vector<2x32xf32>
    %448 = arith.mulf %432, %440 : vector<2x32xf32>
    %449 = arith.addf %447, %448 : vector<2x32xf32>
    %450 = math.tanh %449 : vector<2x32xf32>
    %451 = arith.mulf %446, %450 : vector<2x32xf32>
    %452 = arith.truncf %426 : vector<2x32xf32> to vector<2x32xbf16>
    %453 = arith.index_cast %c5_i32 : i32 to index
    %c0_99 = arith.constant 0 : index
    %c0_100 = arith.constant 0 : index
    %454 = vector.load %arg4[%453, %c0_99, %c0_100] : memref<8x2x32xbf16, #tpu.memory_space<vmem>>, vector<1x2x32xbf16>
    %455 = vector.shape_cast %454 : vector<1x2x32xbf16> to vector<2x32xbf16>
    %456 = vector.shape_cast %452 : vector<2x32xbf16> to vector<1x2x32xbf16>
    tpu.vector_store %arg4[%453, %c0_99, %c0_100], %456 {strides = array<i32>} : memref<8x2x32xbf16, #tpu.memory_space<vmem>>, vector<1x2x32xbf16>,
    %457 = arith.truncf %451 : vector<2x32xf32> to vector<2x32xbf16>
    %458 = arith.index_cast %387 : i32 to index
    %c0_101 = arith.constant 0 : index
    %c0_102 = arith.constant 0 : index
    %459 = vector.load %arg5[%458, %c0_101, %c0_102] : memref<8x2x32xbf16, #tpu.memory_space<vmem>>, vector<1x2x32xbf16>
    %460 = vector.shape_cast %459 : vector<1x2x32xbf16> to vector<2x32xbf16>
    %461 = vector.shape_cast %457 : vector<2x32xbf16> to vector<1x2x32xbf16>
    tpu.vector_store %arg5[%458, %c0_101, %c0_102], %461 {strides = array<i32>} : memref<8x2x32xbf16, #tpu.memory_space<vmem>>, vector<1x2x32xbf16>,
    %462 = tpu.concatenate %426, %451 in 1 : vector<2x32xf32>, vector<2x32xf32> -> vector<2x64xf32>
    %c6_i32 = arith.constant 6 : i32
    %c7_i32_103 = arith.constant 7 : i32
    %463 = arith.subi %c7_i32_103, %c6_i32 : i32
    %464 = arith.truncf %462 : vector<2x64xf32> to vector<2x64xbf16>
    %cst_104 = arith.constant dense<0.000000e+00> : vector<2x256xf32>
    %465 = tpu.matmul %464, %3, %cst_104 {dimension_numbers = #tpu.dot_dimension_numbers<[1], [0], [0], [1], [0, 0, 1, 1], [], []>} : vector<2x64xbf16>, vector<64x256xbf16>, vector<2x256xf32> -> vector<2x256xf32>
    %466 = arith.index_cast %c6_i32 : i32 to index
    %c0_105 = arith.constant 0 : index
    %c0_106 = arith.constant 0 : index
    %467 = vector.load %arg1[%466, %c0_105, %c0_106] : memref<8x2x128xbf16, #tpu.memory_space<vmem>>, vector<1x2x128xbf16>
    %468 = vector.shape_cast %467 : vector<1x2x128xbf16> to vector<2x128xbf16>
    %469 = arith.extf %468 : vector<2x128xbf16> to vector<2x128xf32>
    %470 = vector.extract_strided_slice %465 {offsets = [0, 0], sizes = [2, 128], strides = [1, 1]} : vector<2x256xf32> to vector<2x128xf32>
    %471 = arith.addf %469, %470 : vector<2x128xf32>
    %472 = arith.index_cast %463 : i32 to index
    %c0_107 = arith.constant 0 : index
    %c0_108 = arith.constant 0 : index
    %473 = vector.load %arg2[%472, %c0_107, %c0_108] : memref<8x2x128xbf16, #tpu.memory_space<vmem>>, vector<1x2x128xbf16>
    %474 = vector.shape_cast %473 : vector<1x2x128xbf16> to vector<2x128xbf16>
    %475 = arith.extf %474 : vector<2x128xbf16> to vector<2x128xf32>
    %476 = vector.extract_strided_slice %465 {offsets = [0, 128], sizes = [2, 128], strides = [1, 1]} : vector<2x256xf32> to vector<2x128xf32>
    %477 = arith.addf %475, %476 : vector<2x128xf32>
    %478 = vector.extract_strided_slice %471 {offsets = [0, 0], sizes = [2, 32], strides = [1, 1]} : vector<2x128xf32> to vector<2x32xf32>
    %479 = arith.negf %478 : vector<2x32xf32>
    %480 = math.exp %479 : vector<2x32xf32>
    %cst_109 = arith.constant 1.000000e+00 : f32
    %481 = vector.broadcast %cst_109 : f32 to vector<2x32xf32>
    %482 = arith.addf %481, %480 : vector<2x32xf32>
    %483 = arith.divf %481, %482 : vector<2x32xf32>
    %484 = vector.extract_strided_slice %471 {offsets = [0, 32], sizes = [2, 32], strides = [1, 1]} : vector<2x128xf32> to vector<2x32xf32>
    %485 = arith.negf %484 : vector<2x32xf32>
    %486 = math.exp %485 : vector<2x32xf32>
    %cst_110 = arith.constant 1.000000e+00 : f32
    %487 = vector.broadcast %cst_110 : f32 to vector<2x32xf32>
    %488 = arith.addf %487, %486 : vector<2x32xf32>
    %489 = arith.divf %487, %488 : vector<2x32xf32>
    %490 = vector.extract_strided_slice %471 {offsets = [0, 64], sizes = [2, 32], strides = [1, 1]} : vector<2x128xf32> to vector<2x32xf32>
    %491 = math.tanh %490 : vector<2x32xf32>
    %492 = vector.extract_strided_slice %471 {offsets = [0, 96], sizes = [2, 32], strides = [1, 1]} : vector<2x128xf32> to vector<2x32xf32>
    %493 = arith.negf %492 : vector<2x32xf32>
    %494 = math.exp %493 : vector<2x32xf32>
    %cst_111 = arith.constant 1.000000e+00 : f32
    %495 = vector.broadcast %cst_111 : f32 to vector<2x32xf32>
    %496 = arith.addf %495, %494 : vector<2x32xf32>
    %497 = arith.divf %495, %496 : vector<2x32xf32>
    %498 = arith.mulf %489, %424 : vector<2x32xf32>
    %499 = arith.mulf %483, %491 : vector<2x32xf32>
    %500 = arith.addf %498, %499 : vector<2x32xf32>
    %501 = math.tanh %500 : vector<2x32xf32>
    %502 = arith.mulf %497, %501 : vector<2x32xf32>
    %503 = vector.extract_strided_slice %477 {offsets = [0, 0], sizes = [2, 32], strides = [1, 1]} : vector<2x128xf32> to vector<2x32xf32>
    %504 = arith.negf %503 : vector<2x32xf32>
    %505 = math.exp %504 : vector<2x32xf32>
    %cst_112 = arith.constant 1.000000e+00 : f32
    %506 = vector.broadcast %cst_112 : f32 to vector<2x32xf32>
    %507 = arith.addf %506, %505 : vector<2x32xf32>
    %508 = arith.divf %506, %507 : vector<2x32xf32>
    %509 = vector.extract_strided_slice %477 {offsets = [0, 32], sizes = [2, 32], strides = [1, 1]} : vector<2x128xf32> to vector<2x32xf32>
    %510 = arith.negf %509 : vector<2x32xf32>
    %511 = math.exp %510 : vector<2x32xf32>
    %cst_113 = arith.constant 1.000000e+00 : f32
    %512 = vector.broadcast %cst_113 : f32 to vector<2x32xf32>
    %513 = arith.addf %512, %511 : vector<2x32xf32>
    %514 = arith.divf %512, %513 : vector<2x32xf32>
    %515 = vector.extract_strided_slice %477 {offsets = [0, 64], sizes = [2, 32], strides = [1, 1]} : vector<2x128xf32> to vector<2x32xf32>
    %516 = math.tanh %515 : vector<2x32xf32>
    %517 = vector.extract_strided_slice %477 {offsets = [0, 96], sizes = [2, 32], strides = [1, 1]} : vector<2x128xf32> to vector<2x32xf32>
    %518 = arith.negf %517 : vector<2x32xf32>
    %519 = math.exp %518 : vector<2x32xf32>
    %cst_114 = arith.constant 1.000000e+00 : f32
    %520 = vector.broadcast %cst_114 : f32 to vector<2x32xf32>
    %521 = arith.addf %520, %519 : vector<2x32xf32>
    %522 = arith.divf %520, %521 : vector<2x32xf32>
    %523 = arith.mulf %514, %449 : vector<2x32xf32>
    %524 = arith.mulf %508, %516 : vector<2x32xf32>
    %525 = arith.addf %523, %524 : vector<2x32xf32>
    %526 = math.tanh %525 : vector<2x32xf32>
    %527 = arith.mulf %522, %526 : vector<2x32xf32>
    %528 = arith.truncf %502 : vector<2x32xf32> to vector<2x32xbf16>
    %529 = arith.index_cast %c6_i32 : i32 to index
    %c0_115 = arith.constant 0 : index
    %c0_116 = arith.constant 0 : index
    %530 = vector.load %arg4[%529, %c0_115, %c0_116] : memref<8x2x32xbf16, #tpu.memory_space<vmem>>, vector<1x2x32xbf16>
    %531 = vector.shape_cast %530 : vector<1x2x32xbf16> to vector<2x32xbf16>
    %532 = vector.shape_cast %528 : vector<2x32xbf16> to vector<1x2x32xbf16>
    tpu.vector_store %arg4[%529, %c0_115, %c0_116], %532 {strides = array<i32>} : memref<8x2x32xbf16, #tpu.memory_space<vmem>>, vector<1x2x32xbf16>,
    %533 = arith.truncf %527 : vector<2x32xf32> to vector<2x32xbf16>
    %534 = arith.index_cast %463 : i32 to index
    %c0_117 = arith.constant 0 : index
    %c0_118 = arith.constant 0 : index
    %535 = vector.load %arg5[%534, %c0_117, %c0_118] : memref<8x2x32xbf16, #tpu.memory_space<vmem>>, vector<1x2x32xbf16>
    %536 = vector.shape_cast %535 : vector<1x2x32xbf16> to vector<2x32xbf16>
    %537 = vector.shape_cast %533 : vector<2x32xbf16> to vector<1x2x32xbf16>
    tpu.vector_store %arg5[%534, %c0_117, %c0_118], %537 {strides = array<i32>} : memref<8x2x32xbf16, #tpu.memory_space<vmem>>, vector<1x2x32xbf16>,
    %538 = tpu.concatenate %502, %527 in 1 : vector<2x32xf32>, vector<2x32xf32> -> vector<2x64xf32>
    %c7_i32_119 = arith.constant 7 : i32
    %c7_i32_120 = arith.constant 7 : i32
    %539 = arith.subi %c7_i32_120, %c7_i32_119 : i32
    %540 = arith.truncf %538 : vector<2x64xf32> to vector<2x64xbf16>
    %cst_121 = arith.constant dense<0.000000e+00> : vector<2x256xf32>
    %541 = tpu.matmul %540, %3, %cst_121 {dimension_numbers = #tpu.dot_dimension_numbers<[1], [0], [0], [1], [0, 0, 1, 1], [], []>} : vector<2x64xbf16>, vector<64x256xbf16>, vector<2x256xf32> -> vector<2x256xf32>
    %542 = arith.index_cast %c7_i32_119 : i32 to index
    %c0_122 = arith.constant 0 : index
    %c0_123 = arith.constant 0 : index
    %543 = vector.load %arg1[%542, %c0_122, %c0_123] : memref<8x2x128xbf16, #tpu.memory_space<vmem>>, vector<1x2x128xbf16>
    %544 = vector.shape_cast %543 : vector<1x2x128xbf16> to vector<2x128xbf16>
    %545 = arith.extf %544 : vector<2x128xbf16> to vector<2x128xf32>
    %546 = vector.extract_strided_slice %541 {offsets = [0, 0], sizes = [2, 128], strides = [1, 1]} : vector<2x256xf32> to vector<2x128xf32>
    %547 = arith.addf %545, %546 : vector<2x128xf32>
    %548 = arith.index_cast %539 : i32 to index
    %c0_124 = arith.constant 0 : index
    %c0_125 = arith.constant 0 : index
    %549 = vector.load %arg2[%548, %c0_124, %c0_125] : memref<8x2x128xbf16, #tpu.memory_space<vmem>>, vector<1x2x128xbf16>
    %550 = vector.shape_cast %549 : vector<1x2x128xbf16> to vector<2x128xbf16>
    %551 = arith.extf %550 : vector<2x128xbf16> to vector<2x128xf32>
    %552 = vector.extract_strided_slice %541 {offsets = [0, 128], sizes = [2, 128], strides = [1, 1]} : vector<2x256xf32> to vector<2x128xf32>
    %553 = arith.addf %551, %552 : vector<2x128xf32>
    %554 = vector.extract_strided_slice %547 {offsets = [0, 0], sizes = [2, 32], strides = [1, 1]} : vector<2x128xf32> to vector<2x32xf32>
    %555 = arith.negf %554 : vector<2x32xf32>
    %556 = math.exp %555 : vector<2x32xf32>
    %cst_126 = arith.constant 1.000000e+00 : f32
    %557 = vector.broadcast %cst_126 : f32 to vector<2x32xf32>
    %558 = arith.addf %557, %556 : vector<2x32xf32>
    %559 = arith.divf %557, %558 : vector<2x32xf32>
    %560 = vector.extract_strided_slice %547 {offsets = [0, 32], sizes = [2, 32], strides = [1, 1]} : vector<2x128xf32> to vector<2x32xf32>
    %561 = arith.negf %560 : vector<2x32xf32>
    %562 = math.exp %561 : vector<2x32xf32>
    %cst_127 = arith.constant 1.000000e+00 : f32
    %563 = vector.broadcast %cst_127 : f32 to vector<2x32xf32>
    %564 = arith.addf %563, %562 : vector<2x32xf32>
    %565 = arith.divf %563, %564 : vector<2x32xf32>
    %566 = vector.extract_strided_slice %547 {offsets = [0, 64], sizes = [2, 32], strides = [1, 1]} : vector<2x128xf32> to vector<2x32xf32>
    %567 = math.tanh %566 : vector<2x32xf32>
    %568 = vector.extract_strided_slice %547 {offsets = [0, 96], sizes = [2, 32], strides = [1, 1]} : vector<2x128xf32> to vector<2x32xf32>
    %569 = arith.negf %568 : vector<2x32xf32>
    %570 = math.exp %569 : vector<2x32xf32>
    %cst_128 = arith.constant 1.000000e+00 : f32
    %571 = vector.broadcast %cst_128 : f32 to vector<2x32xf32>
    %572 = arith.addf %571, %570 : vector<2x32xf32>
    %573 = arith.divf %571, %572 : vector<2x32xf32>
    %574 = arith.mulf %565, %500 : vector<2x32xf32>
    %575 = arith.mulf %559, %567 : vector<2x32xf32>
    %576 = arith.addf %574, %575 : vector<2x32xf32>
    %577 = math.tanh %576 : vector<2x32xf32>
    %578 = arith.mulf %573, %577 : vector<2x32xf32>
    %579 = vector.extract_strided_slice %553 {offsets = [0, 0], sizes = [2, 32], strides = [1, 1]} : vector<2x128xf32> to vector<2x32xf32>
    %580 = arith.negf %579 : vector<2x32xf32>
    %581 = math.exp %580 : vector<2x32xf32>
    %cst_129 = arith.constant 1.000000e+00 : f32
    %582 = vector.broadcast %cst_129 : f32 to vector<2x32xf32>
    %583 = arith.addf %582, %581 : vector<2x32xf32>
    %584 = arith.divf %582, %583 : vector<2x32xf32>
    %585 = vector.extract_strided_slice %553 {offsets = [0, 32], sizes = [2, 32], strides = [1, 1]} : vector<2x128xf32> to vector<2x32xf32>
    %586 = arith.negf %585 : vector<2x32xf32>
    %587 = math.exp %586 : vector<2x32xf32>
    %cst_130 = arith.constant 1.000000e+00 : f32
    %588 = vector.broadcast %cst_130 : f32 to vector<2x32xf32>
    %589 = arith.addf %588, %587 : vector<2x32xf32>
    %590 = arith.divf %588, %589 : vector<2x32xf32>
    %591 = vector.extract_strided_slice %553 {offsets = [0, 64], sizes = [2, 32], strides = [1, 1]} : vector<2x128xf32> to vector<2x32xf32>
    %592 = math.tanh %591 : vector<2x32xf32>
    %593 = vector.extract_strided_slice %553 {offsets = [0, 96], sizes = [2, 32], strides = [1, 1]} : vector<2x128xf32> to vector<2x32xf32>
    %594 = arith.negf %593 : vector<2x32xf32>
    %595 = math.exp %594 : vector<2x32xf32>
    %cst_131 = arith.constant 1.000000e+00 : f32
    %596 = vector.broadcast %cst_131 : f32 to vector<2x32xf32>
    %597 = arith.addf %596, %595 : vector<2x32xf32>
    %598 = arith.divf %596, %597 : vector<2x32xf32>
    %599 = arith.mulf %590, %525 : vector<2x32xf32>
    %600 = arith.mulf %584, %592 : vector<2x32xf32>
    %601 = arith.addf %599, %600 : vector<2x32xf32>
    %602 = math.tanh %601 : vector<2x32xf32>
    %603 = arith.mulf %598, %602 : vector<2x32xf32>
    %604 = arith.truncf %578 : vector<2x32xf32> to vector<2x32xbf16>
    %605 = arith.index_cast %c7_i32_119 : i32 to index
    %c0_132 = arith.constant 0 : index
    %c0_133 = arith.constant 0 : index
    %606 = vector.load %arg4[%605, %c0_132, %c0_133] : memref<8x2x32xbf16, #tpu.memory_space<vmem>>, vector<1x2x32xbf16>
    %607 = vector.shape_cast %606 : vector<1x2x32xbf16> to vector<2x32xbf16>
    %608 = vector.shape_cast %604 : vector<2x32xbf16> to vector<1x2x32xbf16>
    tpu.vector_store %arg4[%605, %c0_132, %c0_133], %608 {strides = array<i32>} : memref<8x2x32xbf16, #tpu.memory_space<vmem>>, vector<1x2x32xbf16>,
    %609 = arith.truncf %603 : vector<2x32xf32> to vector<2x32xbf16>
    %610 = arith.index_cast %539 : i32 to index
    %c0_134 = arith.constant 0 : index
    %c0_135 = arith.constant 0 : index
    %611 = vector.load %arg5[%610, %c0_134, %c0_135] : memref<8x2x32xbf16, #tpu.memory_space<vmem>>, vector<1x2x32xbf16>
    %612 = vector.shape_cast %611 : vector<1x2x32xbf16> to vector<2x32xbf16>
    %613 = vector.shape_cast %609 : vector<2x32xbf16> to vector<1x2x32xbf16>
    tpu.vector_store %arg5[%610, %c0_134, %c0_135], %613 {strides = array<i32>} : memref<8x2x32xbf16, #tpu.memory_space<vmem>>, vector<1x2x32xbf16>,
    %614 = tpu.concatenate %578, %603 in 1 : vector<2x32xf32>, vector<2x32xf32> -> vector<2x64xf32>
    %c8_i32 = arith.constant 8 : i32
    %c0_136 = arith.constant 0 : index
    %c0_137 = arith.constant 0 : index
    %615 = vector.load %arg6[%c0_136, %c0_137] : memref<2x64xf32, #tpu.memory_space<vmem>>, vector<2x64xf32>
    tpu.vector_store %arg6[%c0_136, %c0_137], %614 {strides = array<i32>} : memref<2x64xf32, #tpu.memory_space<vmem>>, vector<2x64xf32>,
    %c0_138 = arith.constant 0 : index
    %c0_139 = arith.constant 0 : index
    %616 = vector.load %arg7[%c0_138, %c0_139] : memref<2x32xf32, #tpu.memory_space<vmem>>, vector<2x32xf32>
    tpu.vector_store %arg7[%c0_138, %c0_139], %576 {strides = array<i32>} : memref<2x32xf32, #tpu.memory_space<vmem>>, vector<2x32xf32>,
    %c0_140 = arith.constant 0 : index
    %c0_141 = arith.constant 0 : index
    %617 = vector.load %arg8[%c0_140, %c0_141] : memref<2x32xf32, #tpu.memory_space<vmem>>, vector<2x32xf32>
    tpu.vector_store %arg8[%c0_140, %c0_141], %601 {strides = array<i32>} : memref<2x32xf32, #tpu.memory_space<vmem>>, vector<2x32xf32>,
    return
  }
  func.func @transform_0(%arg0: i32) -> (i32, i32, i32) {
    %c0_i32 = arith.constant 0 : i32
    %c0_i32_0 = arith.constant 0 : i32
    %c0_i32_1 = arith.constant 0 : i32
    return %arg0, %c0_i32, %c0_i32_0 : i32, i32, i32
  }
  func.func @transform_1(%arg0: i32) -> (i32, i32, i32) {
    %c0_i32 = arith.constant 0 : i32
    %0 = arith.subi %c0_i32, %arg0 : i32
    %c0_i32_0 = arith.constant 0 : i32
    %c1_i32 = arith.constant 1 : i32
    %c0_i32_1 = arith.constant 0 : i32
    return %0, %c0_i32_0, %c1_i32 : i32, i32, i32
  }
  func.func @transform_2(%arg0: i32) -> (i32, i32) {
    %c0_i32 = arith.constant 0 : i32
    %c0_i32_0 = arith.constant 0 : i32
    %c0_i32_1 = arith.constant 0 : i32
    return %c0_i32, %c0_i32_0 : i32, i32
  }
  func.func @transform_3(%arg0: i32) -> (i32, i32, i32) {
    %c0_i32 = arith.constant 0 : i32
    %c0_i32_0 = arith.constant 0 : i32
    %c0_i32_1 = arith.constant 0 : i32
    return %arg0, %c0_i32, %c0_i32_0 : i32, i32, i32
  }
  func.func @transform_4(%arg0: i32) -> (i32, i32, i32) {
    %c0_i32 = arith.constant 0 : i32
    %0 = arith.subi %c0_i32, %arg0 : i32
    %c0_i32_0 = arith.constant 0 : i32
    %c0_i32_1 = arith.constant 0 : i32
    %c0_i32_2 = arith.constant 0 : i32
    return %0, %c0_i32_0, %c0_i32_1 : i32, i32, i32
  }
}

module attributes {stable_mosaic.version = 11 : i64} {
  func.func @_gelu_linear_kernel(%arg0: i32, %arg1: memref<16x32xbf16, #tpu.memory_space<vmem>>, %arg2: memref<16x32xbf16, #tpu.memory_space<vmem>>, %arg3: memref<32x2xbf16, #tpu.memory_space<vmem>>, %arg4: memref<32x2xbf16, #tpu.memory_space<vmem>>, %arg5: memref<1x2xf32, #tpu.memory_space<vmem>>, %arg6: memref<16x2xf32, #tpu.memory_space<vmem>>) attributes {dimension_semantics = [#tpu.dimension_semantics<parallel>], iteration_bounds = array<i64: 1>, scalar_prefetch = 0 : i64, scratch_operands = 0 : i64, tpu.core_type = #tpu.core_type<tc>, window_params = [{transform_indices = @transform_0, window_bounds = array<i64: 16, 32>}, {transform_indices = @transform_1, window_bounds = array<i64: 16, 32>}, {pipeline_mode = #tpu.pipeline_mode<synchronous>, transform_indices = @transform_2, window_bounds = array<i64: 32, 2>}, {pipeline_mode = #tpu.pipeline_mode<synchronous>, transform_indices = @transform_3, window_bounds = array<i64: 32, 2>}, {pipeline_mode = #tpu.pipeline_mode<synchronous>, transform_indices = @transform_4, window_bounds = array<i64: 1, 2>}, {transform_indices = @transform_5, window_bounds = array<i64: 16, 2>}]} {
    %c0 = arith.constant 0 : index
    %c0_0 = arith.constant 0 : index
    %0 = vector.load %arg1[%c0, %c0_0] : memref<16x32xbf16, #tpu.memory_space<vmem>>, vector<16x32xbf16>
    %1 = arith.extf %0 : vector<16x32xbf16> to vector<16x32xf32>
    %c0_1 = arith.constant 0 : index
    %c0_2 = arith.constant 0 : index
    %2 = vector.load %arg2[%c0_1, %c0_2] : memref<16x32xbf16, #tpu.memory_space<vmem>>, vector<16x32xbf16>
    %3 = arith.extf %2 : vector<16x32xbf16> to vector<16x32xf32>
    %cst = arith.constant 5.000000e-01 : f32
    %4 = vector.broadcast %cst : f32 to vector<16x32xf32>
    %5 = arith.mulf %4, %1 : vector<16x32xf32>
    %cst_3 = arith.constant 0.707106769 : f32
    %6 = vector.broadcast %cst_3 : f32 to vector<16x32xf32>
    %7 = arith.mulf %1, %6 : vector<16x32xf32>
    %8 = math.erf %7 : vector<16x32xf32>
    %cst_4 = arith.constant 1.000000e+00 : f32
    %9 = vector.broadcast %cst_4 : f32 to vector<16x32xf32>
    %10 = arith.addf %9, %8 : vector<16x32xf32>
    %11 = arith.mulf %5, %10 : vector<16x32xf32>
    %cst_5 = arith.constant 5.000000e-01 : f32
    %12 = vector.broadcast %cst_5 : f32 to vector<16x32xf32>
    %13 = arith.mulf %12, %3 : vector<16x32xf32>
    %cst_6 = arith.constant 0.707106769 : f32
    %14 = vector.broadcast %cst_6 : f32 to vector<16x32xf32>
    %15 = arith.mulf %3, %14 : vector<16x32xf32>
    %16 = math.erf %15 : vector<16x32xf32>
    %cst_7 = arith.constant 1.000000e+00 : f32
    %17 = vector.broadcast %cst_7 : f32 to vector<16x32xf32>
    %18 = arith.addf %17, %16 : vector<16x32xf32>
    %19 = arith.mulf %13, %18 : vector<16x32xf32>
    %20 = arith.truncf %11 : vector<16x32xf32> to vector<16x32xbf16>
    %c0_8 = arith.constant 0 : index
    %c0_9 = arith.constant 0 : index
    %21 = vector.load %arg3[%c0_8, %c0_9] : memref<32x2xbf16, #tpu.memory_space<vmem>>, vector<32x2xbf16>
    %cst_10 = arith.constant dense<0.000000e+00> : vector<16x2xf32>
    %22 = tpu.matmul %20, %21, %cst_10 {dimension_numbers = #tpu.dot_dimension_numbers<[1], [0], [0], [1], [0, 0, 1, 1], [], []>} : vector<16x32xbf16>, vector<32x2xbf16>, vector<16x2xf32> -> vector<16x2xf32>
    %23 = arith.truncf %19 : vector<16x32xf32> to vector<16x32xbf16>
    %c0_11 = arith.constant 0 : index
    %c0_12 = arith.constant 0 : index
    %24 = vector.load %arg4[%c0_11, %c0_12] : memref<32x2xbf16, #tpu.memory_space<vmem>>, vector<32x2xbf16>
    %cst_13 = arith.constant dense<0.000000e+00> : vector<16x2xf32>
    %25 = tpu.matmul %23, %24, %cst_13 {dimension_numbers = #tpu.dot_dimension_numbers<[1], [0], [0], [1], [0, 0, 1, 1], [], []>} : vector<16x32xbf16>, vector<32x2xbf16>, vector<16x2xf32> -> vector<16x2xf32>
    %26 = arith.addf %22, %25 : vector<16x2xf32>
    %c0_14 = arith.constant 0 : index
    %c0_15 = arith.constant 0 : index
    %27 = vector.load %arg5[%c0_14, %c0_15] : memref<1x2xf32, #tpu.memory_space<vmem>>, vector<1x2xf32>
    %28 = vector.broadcast %27 : vector<1x2xf32> to vector<16x2xf32>
    %29 = arith.addf %26, %28 : vector<16x2xf32>
    %c0_16 = arith.constant 0 : index
    %c0_17 = arith.constant 0 : index
    %30 = vector.load %arg6[%c0_16, %c0_17] : memref<16x2xf32, #tpu.memory_space<vmem>>, vector<16x2xf32>
    tpu.vector_store %arg6[%c0_16, %c0_17], %29 {strides = array<i32>} : memref<16x2xf32, #tpu.memory_space<vmem>>, vector<16x2xf32>,
    return
  }
  func.func @transform_0(%arg0: i32) -> (i32, i32) {
    %c0_i32 = arith.constant 0 : i32
    %c0_i32_0 = arith.constant 0 : i32
    return %arg0, %c0_i32 : i32, i32
  }
  func.func @transform_1(%arg0: i32) -> (i32, i32) {
    %c0_i32 = arith.constant 0 : i32
    %c0_i32_0 = arith.constant 0 : i32
    return %arg0, %c0_i32 : i32, i32
  }
  func.func @transform_2(%arg0: i32) -> (i32, i32) {
    %c0_i32 = arith.constant 0 : i32
    %c0_i32_0 = arith.constant 0 : i32
    %c0_i32_1 = arith.constant 0 : i32
    return %c0_i32, %c0_i32_0 : i32, i32
  }
  func.func @transform_3(%arg0: i32) -> (i32, i32) {
    %c0_i32 = arith.constant 0 : i32
    %c0_i32_0 = arith.constant 0 : i32
    %c0_i32_1 = arith.constant 0 : i32
    return %c0_i32, %c0_i32_0 : i32, i32
  }
  func.func @transform_4(%arg0: i32) -> (i32, i32) {
    %c0_i32 = arith.constant 0 : i32
    %c0_i32_0 = arith.constant 0 : i32
    %c0_i32_1 = arith.constant 0 : i32
    return %c0_i32, %c0_i32_0 : i32, i32
  }
  func.func @transform_5(%arg0: i32) -> (i32, i32) {
    %c0_i32 = arith.constant 0 : i32
    %c0_i32_0 = arith.constant 0 : i32
    return %arg0, %c0_i32 : i32, i32
  }
}

</mosaic_0001>

<bundles_post_ra>
// kernel: lstm_reg_forward.5
= control target key start
LH: loop header
LB: loop body
LE: loop exit
PB: predicated region body
PF: predicated region fallthrough
CT: control target
= control target key end

     0   :  { %8 = vsyncpa [#allocation3], 0  ;;  %s156_s12 = smov [#allocation2]   ;;  %s196_s0 = inlined_call_operand.vmem [shape: f32[16,4], index: 0, kind: input, shape index: {}]   ;;  %s197_s1 = inlined_call_operand.vmem [shape: bf16[4,256], index: 1, kind: input, shape index: {}]   ;;  %s198_s2 = inlined_call_operand.hbm [shape: f32[1,256], index: 2, kind: input, shape index: {}]   ;;  %s199_s3 = inlined_call_operand.vmem [shape: bf16[16,256], index: 3, kind: output, shape index: {}]  }
   0x1   :  { %s19_s13 = sshll.u32 %s156_s12, 4  ;;  %s20_s13 = int_to_ptr.vmem [resolvable:$true] %s19_s13 }
   0x2   :  { %s142_s14 = scalar_lea.vmem %s20_s13, 32  ;;  %p147_p1 = scmp.lt.s32.totalorder %s20_s13, %s20_s13 }
   0x3   :  { %p143_p0 = scmp.ne.s32.totalorder %s20_s13, %s142_s14  ;;  %p148_p2 = scmp.lt.s32.totalorder %s142_s14, %s142_s14 }
   0x5   :  { %p149_p3 = por %p148_p2, %p147_p1 }
   0x7   :  { %p150_p4 = pnand %p149_p3, %p143_p0 }
   0x9   :  { %153 = shalt.err (!%p150_p4)
}
   0xa   :  { %22 = dma.hbm_to_vmem [thread:$0]  %s198_s2, 32, %s20_s13, [#allocation3]  }
   0xb   :  { %154 = dma.done.wait [#allocation3], 32  }
   0xc   :  { %155 = vsyncadd [#allocation3], 4294967264  ;;  %v157_v0 = vmov 0   ;;  %vm56_vm0 = vcmask 1041408   ;;  %v27_v2 = vld [vmem:[%s196_s0] sm:$0xff]  ;;  %v28_v3 = vld [vmem:[%s196_s0 + $0x8] sm:$0xff]  ;;  %v33_v7 = vlaneseq }
   0xd   :  { %95 = vmatprep.mubr.bf16.mxu0 %v157_v0  ;;  %v125_v1 = vld.sshfl [vmem:[%s197_s1] sm:$0x33 pattern:$0x76325410]  ;;  %v29_v6 = vpack.c.bf16 %v28_v3, %v27_v2  ;;  %vm52_vm1 = vcmask 31744  }
   0xe   :  { %v51_v4 = vcombine.high %v125_v1, %v125_v1  ;;  %v58_v5 = vsel %vm56_vm0, %v125_v1, 0  ;;  %v34_v8 = vshrl.u32 %v33_v7, 7  ;;  %v31_v11 = vld [vmem:[#allocation2] sm:$0x3] }
  0x10   :  { %126 = vmatprep.subr.msk.bf16.mxu0 %vm56_vm0, %v51_v4  ;;  %v35_v9 = vsub.s32 0, %v34_v8  ;;  %v39_v10 = vsub.s32 1, %v34_v8 }
  0x11   :  { %78 = vmatpush1.bf16.msra.mxu0 %v58_v5 }
  0x12   :  { %v36_v12 = vrot.slane %v31_v11, %v35_v9  ;;  %v40_v13 = vrot.slane %v31_v11, %v39_v10 }
  0x14   :  { %127 = vmatmul.mubr.msk.bf16.vlgmr.msra.gmra.mxu0 %vm52_vm1, %v29_v6 }
  0xd4   :  { %v97_v14 = vpop.f32.mrf.mxu0 }
  0xd5   :  { %v98_v16 = vadd.f32 %v97_v14, %v36_v12 }
  0xd6   :  { %v99_v15 = vpop.f32.mrf.mxu0 }
  0xd7   :  { %v100_v17 = vadd.f32 %v99_v15, %v40_v13 }
  0xd8   :  { %v101_v18 = vpop.f32.mrf.mxu0 }
  0xd9   :  { %v130_v19 = vpack.c.bf16 %v100_v17, %v98_v16  ;;  %v102_v21 = vadd.f32 %v101_v18, %v36_v12 }
  0xda   :  { %v103_v20 = vpop.f32.mrf.mxu0 }
  0xdb   :  { %118 = vst [vmem:[%s199_s3] sm:$0xff] %v130_v19  ;;  %v104_v22 = vadd.f32 %v103_v20, %v40_v13 }
  0xdd   :  { %v131_v23 = vpack.c.bf16 %v104_v22, %v102_v21 }
  0xdf   :  { %119 = vst [vmem:[%s199_s3 + $0x8] sm:$0xff] %v131_v23 }
  0xe0   :  { %124 = vsyncpa [#allocation3], 1 }

// kernel: lstm_reg_forward.7
= control target key start
LH: loop header
LB: loop body
LE: loop exit
PB: predicated region body
PF: predicated region fallthrough
CT: control target
= control target key end

     0   :  { %v241_v1 = vmov 0   ;;  %vm58_vm0 = vcmask 261120   ;;  %v178_v11 = vlaneseq  ;;  %s311_s3 = inlined_call_operand.vmem [shape: bf16[32,256], index: 3, kind: input, shape index: {}]   ;;  %s312_s2 = inlined_call_operand.vmem [shape: bf16[32,256], index: 2, kind: input, shape index: {}]   ;;  %s313_s1 = inlined_call_operand.vmem [shape: bf16[16,32], index: 1, kind: input, shape index: {}]   ;;  %s314_s0 = inlined_call_operand.vmem [shape: bf16[16,32], index: 0, kind: input, shape index: {}]   ;;  %s315_s4 = inlined_call_operand.vmem [shape: f32[1,256], index: 4, kind: input, shape index: {}]   ;;  %s316_s5 = inlined_call_operand.vmem [shape: bf16[16,256], index: 5, kind: output, shape index: {}]  }
   0x1   :  { %v227_v0 = vld [vmem:[%s311_s3 + $0x14] ss:$8 sps:$4 sm:$0xff]   ;;  %94 = vmatprep.mubr.bf16.mxu0 %v241_v1  ;;  %165 = vmatprep.mubr.bf16.mxu1 %v241_v1  ;;  %v231_v3 = vld [vmem:[%s311_s3 + $0x10] ss:$8 sps:$4 sm:$0xff]   ;;  %v233_v5 = vld [vmem:[%s311_s3 + $0x4] ss:$8 sps:$4 sm:$0xff]  }
   0x2   :  { %v229_v2 = vld [vmem:[%s312_s2 + $0x14] ss:$8 sps:$4 sm:$0xff]   ;;  %74 = vmatprep.subr.bf16.mxu0 %v227_v0  ;;  %v232_v4 = vld [vmem:[%s312_s2 + $0x10] ss:$8 sps:$4 sm:$0xff]   ;;  %v235_v6 = vld [vmem:[%s312_s2 + $0x4] ss:$8 sps:$4 sm:$0xff]  }
   0x3   :  { %145 = vmatprep.subr.bf16.mxu1 %v229_v2  ;;  %75 = vmatpush1.bf16.msra.mxu0 %v231_v3  ;;  %v237_v7 = vld [vmem:[%s311_s3] ss:$8 sps:$4 sm:$0xff]   ;;  %v179_v12 = vshrl.u32 %v178_v11, 7 }
   0x4   :  { %146 = vmatpush1.bf16.msra.mxu1 %v232_v4  ;;  %76 = vmatprep.subr.bf16.mxu0 %v233_v5  ;;  %v238_v8 = vld [vmem:[%s312_s2] ss:$8 sps:$4 sm:$0xff]  }
   0x5   :  { %147 = vmatprep.subr.bf16.mxu1 %v235_v6  ;;  %v239_v9 = vld [vmem:[%s313_s1] sm:$0xff]   ;;  %v180_v13 = vsub.s32 0, %v179_v12  ;;  %v184_v14 = vsub.s32 1, %v179_v12 }
   0x6   :  { %v240_v10 = vld [vmem:[%s314_s0] sm:$0xff]  }
   0x7   :  { %77 = vmatpush1.bf16.msra.mxu0 %v237_v7  ;;  %v176_v15 = vld [vmem:[%s315_s4] sm:$0x3] }
   0x8   :  { %148 = vmatpush1.bf16.msra.mxu1 %v238_v8  ;;  %v181_v19 = vrot.slane %v176_v15, %v180_v13  ;;  %v185_v20 = vrot.slane %v176_v15, %v184_v14 }
   0xa   :  { %215 = vmatmul.mubr.msk.bf16.vlgmr.msra.gmra.mxu0 %vm58_vm0, %v239_v9 }
   0xb   :  { %221 = vmatmul.mubr.msk.bf16.vlgmr.msra.gmra.mxu1 %vm58_vm0, %v240_v10 }
  0xca   :  { %v96_v16 = vpop.f32.mrf.mxu0 }
  0xcb   :  { %v167_v17 = vpop.f32.mrf.mxu1 }
  0xcc   :  { %v168_v18 = vadd.f32 %v167_v17, %v96_v16  ;;  %v98_v21 = vpop.f32.mrf.mxu0 }
  0xcd   :  { %v169_v22 = vpop.f32.mrf.mxu1 }
  0xce   :  { %v170_v23 = vadd.f32 %v169_v22, %v98_v21  ;;  %v100_v24 = vpop.f32.mrf.mxu0  ;;  %v188_v26 = vadd.f32 %v181_v19, %v168_v18 }
  0xcf   :  { %v171_v25 = vpop.f32.mrf.mxu1 }
  0xd0   :  { %v189_v27 = vadd.f32 %v185_v20, %v170_v23  ;;  %v172_v28 = vadd.f32 %v171_v25, %v100_v24  ;;  %v102_v29 = vpop.f32.mrf.mxu0 }
  0xd1   :  { %v173_v30 = vpop.f32.mrf.mxu1 }
  0xd2   :  { %v224_v31 = vpack.c.bf16 %v189_v27, %v188_v26  ;;  %v174_v32 = vadd.f32 %v173_v30, %v102_v29  ;;  %v190_v33 = vadd.f32 %v181_v19, %v172_v28 }
  0xd4   :  { %204 = vst [vmem:[%s316_s5] sm:$0xff] %v224_v31  ;;  %v191_v34 = vadd.f32 %v185_v20, %v174_v32 }
  0xd6   :  { %v225_v35 = vpack.c.bf16 %v191_v34, %v190_v33 }
  0xd8   :  { %205 = vst [vmem:[%s316_s5 + $0x8] sm:$0xff] %v225_v35 }

// kernel: lstm_reg_forward.9
= control target key start
LH: loop header
LB: loop body
LE: loop exit
PB: predicated region body
PF: predicated region fallthrough
CT: control target
= control target key end

     0   :  { %v239_v0 = vmov 0.0   ;;  %vm240_vm0 = vmmov 0   ;;  %vm71_vm1 = vcmask 261120   ;;  %vm181_vm2 = vcmask 15360   ;;  %s298_s3 = inlined_call_operand.vmem [shape: bf16[32,2], index: 3, kind: input, shape index: {}]   ;;  %s299_s2 = inlined_call_operand.vmem [shape: bf16[32,2], index: 2, kind: input, shape index: {}]   ;;  %s300_s1 = inlined_call_operand.vmem [shape: bf16[16,32], index: 1, kind: input, shape index: {}]   ;;  %s301_s0 = inlined_call_operand.vmem [shape: bf16[16,32], index: 0, kind: input, shape index: {}]   ;;  %s302_s4 = inlined_call_operand.vmem [shape: f32[1,2], index: 4, kind: input, shape index: {}]   ;;  %s303_s5 = inlined_call_operand.vmem [shape: f32[16,2], index: 5, kind: output, shape index: {}]  }
   0x1   :  { %209 = vmatprep.subr.bf16.mxu0 %v239_v0  ;;  %217 = vmatprep.subr.bf16.mxu1 %v239_v0  ;;  %v227_v1 = vld [vmem:[%s298_s3 + $0x8] sm:$0xff]   ;;  %v229_v3 = vld [vmem:[%s298_s3] sm:$0xff]  }
   0x2   :  { %v228_v2 = vld [vmem:[%s299_s2 + $0x8] sm:$0xff]   ;;  %213 = vmatprep.mubr.msk.bf16.mxu0 %vm240_vm0, %v239_v0  ;;  %221 = vmatprep.mubr.msk.bf16.mxu1 %vm240_vm0, %v239_v0  ;;  %v230_v4 = vld [vmem:[%s299_s2] sm:$0xff]  }
   0x3   :  { %210 = vmatpush3.bf16.msra.mxu0 %v227_v1  ;;  %218 = vmatpush3.bf16.msra.mxu1 %v228_v2  ;;  %v200_v5 = vld [vmem:[%s300_s1] sm:$0xff]  }
   0x4   :  { %211 = vmatprep.subr.bf16.mxu0 %v239_v0  ;;  %219 = vmatprep.subr.bf16.mxu1 %v239_v0  ;;  %v196_v6 = vld [vmem:[%s301_s0] sm:$0xff]   ;;  %v201_v7 = vunpack.c.l.bf16 %v200_v5  ;;  %v202_v8 = vunpack.c.h.bf16 %v200_v5 }
   0x5   :  { %v197_v9 = vunpack.c.l.bf16 %v196_v6  ;;  %v198_v10 = vunpack.c.h.bf16 %v196_v6  ;;  %v194_v35 = vld [vmem:[%s302_s4] ss:$0 sm:$0xff] }
   0x6   :  { %v41_v11 = vmul.f32 0.70710677, %v201_v7  ;;  %v42_v12 = vmul.f32 0.70710677, %v202_v8  ;;  %v39_v15 = vmul.f32 0.5, %v201_v7  ;;  %v40_v17 = vmul.f32 0.5, %v202_v8 }
   0x7   :  { %212 = vmatpush3.bf16.msra.mxu0 %v229_v3  ;;  %220 = vmatpush3.bf16.msra.mxu1 %v230_v4  ;;  %v31_v13 = vmul.f32 0.70710677, %v197_v9  ;;  %v32_v14 = vmul.f32 0.70710677, %v198_v10  ;;  %v29_v20 = vmul.f32 0.5, %v197_v9  ;;  %v30_v23 = vmul.f32 0.5, %v198_v10 }
   0x8   :  { %231 = verf.f32 %v41_v11 }
   0x9   :  { %233 = verf.f32 %v42_v12 }
   0xa   :  { %235 = verf.f32 %v31_v13 }
   0xb   :  { %237 = verf.f32 %v32_v14 }
  0x15   :  { %v232_v16 = vpop.eup %231 }
  0x16   :  { %v234_v18 = vpop.eup %233  ;;  %v45_v19 = vadd.f32 1.0, %v232_v16 }
  0x17   :  { %v236_v21 = vpop.eup %235  ;;  %v46_v22 = vadd.f32 1.0, %v234_v18 }
  0x18   :  { %v238_v24 = vpop.eup %237  ;;  %v47_v25 = vmul.f32 %v45_v19, %v39_v15  ;;  %v35_v26 = vadd.f32 1.0, %v236_v21 }
  0x19   :  { %v48_v27 = vmul.f32 %v46_v22, %v40_v17  ;;  %v36_v28 = vadd.f32 1.0, %v238_v24 }
  0x1a   :  { %v37_v29 = vmul.f32 %v35_v26, %v29_v20 }
  0x1b   :  { %v54_v30 = vpack.c.bf16 %v48_v27, %v47_v25  ;;  %v38_v31 = vmul.f32 %v36_v28, %v30_v23 }
  0x1d   :  { %214 = vmatmul.mubr.msk.bf16.vlgmr.msra.gmra.mxu0 %vm71_vm1, %v54_v30  ;;  %v49_v32 = vpack.c.bf16 %v38_v31, %v37_v29 }
  0x1f   :  { %222 = vmatmul.mubr.msk.bf16.vlgmr.msra.gmra.mxu1 %vm71_vm1, %v49_v32 }
  0xdd   :  { %v109_v33 = vpop.f32.mrf.mxu0 }
  0xdf   :  { %v165_v34 = vpop.f32.mrf.mxu1  ;;  %v215_v36 = vpop.f32.mrf.mxu0 }
  0xe0   :  { %v166_v37 = vadd.f32 %v165_v34, %v109_v33 }
  0xe1   :  { %v223_v38 = vpop.f32.mrf.mxu1  ;;  %v112_v39 = vpop.f32.mrf.mxu0 }
  0xe2   :  { %v179_v40 = vadd.f32 %v194_v35, %v166_v37 }
  0xe3   :  { %v168_v41 = vpop.f32.mrf.mxu1  ;;  %v216_v42 = vpop.f32.mrf.mxu0 }
  0xe4   :  { %182 = vst.msk [vmem:[%s303_s5] sm:$0xff] %vm181_vm2, %v179_v40  ;;  %v169_v43 = vadd.f32 %v168_v41, %v112_v39 }
  0xe5   :  { %v224_v44 = vpop.f32.mrf.mxu1 }
  0xe6   :  { %v180_v45 = vadd.f32 %v194_v35, %v169_v43 }
  0xe8   :  { %183 = vst.msk [vmem:[%s303_s5 + $0x8] sm:$0xff] %vm181_vm2, %v180_v45 }

// kernel: lstm_reg_forward.6
= control target key start
LH: loop header
LB: loop body
LE: loop exit
PB: predicated region body
PF: predicated region fallthrough
CT: control target
= control target key end

     0   :  { %vm182_vm0 = vcmask 517120   ;;  %v1852_v2 = vmov 0   ;;  %v1853_v4 = vmov 0.0   ;;  %vm184_vm1 = vcmask 254976   ;;  %s1854_s7 = smov 32   ;;  %s1855_s9 = smov 64   ;;  %s2398_s0 = inlined_call_operand.vmem [shape: bf16[8,2,256], index: 0, kind: input, shape index: {}, may-alias: {0,1}]   ;;  %s2399_s1 = inlined_call_operand.vmem [shape: bf16[8,2,256], index: 1, kind: input, shape index: {}, may-alias: {0,1}]   ;;  %s2400_s2 = inlined_call_operand.vmem [shape: bf16[64,256], index: 2, kind: input, shape index: {}]   ;;  %s2401_s3 = inlined_call_operand.vmem [shape: bf16[8,2,32], index: 3, kind: output, shape index: {0}]   ;;  %s2402_s4 = inlined_call_operand.vmem [shape: bf16[8,2,32], index: 4, kind: output, shape index: {1}]  }
   0x1   :  { %v1887_v0 = vld [vmem:[%s2400_s2 + $0x34] ss:$8 sps:$4 sm:$0xff]   ;;  %v1892_v1 = vld [vmem:[%s2400_s2 + $0x30] ss:$8 sps:$4 sm:$0xff]   ;;  %275 = vmatprep.mubr.bf16.mxu0 %v1852_v2  ;;  %463 = vmatprep.mubr.bf16.mxu1 %v1852_v2  ;;  %v1900_v3 = vld [vmem:[%s2400_s2 + $0x24] ss:$8 sps:$4 sm:$0xff]   ;;  %v366_v50 = vlaneseq }
   0x2   :  { %251 = vmatprep.subr.bf16.mxu0 %v1887_v0  ;;  %183 = vst.msk [vmem:[#allocation2] sm:$0x3] %vm182_vm0, %v1853_v4  ;;  %439 = vmatprep.subr.bf16.mxu1 %v1887_v0  ;;  %v1908_v5 = vld [vmem:[%s2400_s2 + $0x20] ss:$8 sps:$4 sm:$0xff]   ;;  %v1917_v6 = vld [vmem:[%s2400_s2 + $0x14] ss:$8 sps:$4 sm:$0xff]  }
   0x3   :  { %252 = vmatpush1.bf16.msra.mxu0 %v1892_v1  ;;  %185 = vst.msk [vmem:[#allocation3] sm:$0x3] %vm184_vm1, %v1853_v4  ;;  %186 = vst.msk [vmem:[#allocation4] sm:$0x3] %vm184_vm1, %v1853_v4  ;;  %440 = vmatpush1.bf16.msra.mxu1 %v1892_v1  ;;  %v28_v7 = vld [vmem:[%s2398_s0] sm:$0x1] }
   0x4   :  { %253 = vmatprep.subr.bf16.mxu0 %v1900_v3  ;;  %441 = vmatprep.subr.bf16.mxu1 %v1900_v3  ;;  %29 = vst [vmem:[#allocation5] sm:$0x1] %v28_v7  ;;  %v1927_v8 = vld [vmem:[%s2400_s2 + $0x10] ss:$8 sps:$4 sm:$0xff]   ;;  %v1934_v9 = vld [vmem:[%s2400_s2 + $0x4] ss:$8 sps:$4 sm:$0xff]  }
   0x5   :  { %v1941_v11 = vld [vmem:[%s2400_s2] ss:$8 sps:$4 sm:$0xff]   ;;  %vm239_vm2 = vcmask 523264   ;;  %v1656_v15 = vld [vmem:[%s2399_s1 + $0xf] sm:$0x1]  ;;  %v1977_v53 = vshrl.u32 %v366_v50, 7 }
   0x6   :  { %119 = vst [vmem:[#allocation6 + $0x7] sm:$0x1] %v1656_v15  ;;  %v1856_v51 = vmov 1983009808   ;;  %v30_v56 = vld [vmem:[%s2398_s0 + $0x2] sm:$0x1] }
   0x7   :  { %254 = vmatpush1.bf16.msra.mxu0 %v1908_v5  ;;  %442 = vmatpush1.bf16.msra.mxu1 %v1908_v5  ;;  %v405_v52 = vunpack.c.l.s4 %v1856_v51  ;;  %31 = vst [vmem:[#allocation5 + $0x1] sm:$0x1] %v30_v56  ;;  %vm425_vm3 = vcmask 261120   ;;  %vm380_vm4 = vcmask 253952   ;;  %s1858_s20 = smov 96  }
   0x8   :  { %255 = vmatprep.subr.bf16.mxu0 %v1917_v6  ;;  %443 = vmatprep.subr.bf16.mxu1 %v1917_v6 }
   0x9   :  { %v195_v12 = vld [vmem:[#allocation2] sm:$0x3]  ;;  %v406_v54 = vunpack.c.0.s8 %v405_v52 }
   0xa   :  { %v1667_v10 = vld.sshfl [vmem:[#allocation3] sm:$0x3 pattern:$0x76325410]  ;;  %v198_v14 = vpack.c.bf16 %v195_v12, %v195_v12  ;;  %v1655_v12 = vld [vmem:[%s2399_s1 + $0xd] sm:$0x1] }
   0xb   :  { %256 = vmatpush1.bf16.msra.mxu0 %v1927_v8  ;;  %306 = vrot.lane.b32.xlu1 %v1667_v10, %s1854_s7  ;;  %v1669_v13 = vld.sshfl [vmem:[#allocation4] sm:$0x3 pattern:$0x76325410]  ;;  %v284_v16 = vld [vmem:[#allocation5] sm:$0x1]  ;;  %v1980_v55 = vsub.s32 %v406_v54, %v1977_v53 }
   0xc   :  { %257 = vmatprep.subr.bf16.mxu0 %v1934_v9  ;;  %444 = vmatpush1.bf16.msra.mxu1 %v1927_v8  ;;  %v285_v18 = vunpack.c.l.bf16 %v284_v16  ;;  %117 = vst [vmem:[#allocation6 + $0x6] sm:$0x1] %v1655_v12 }
   0xd   :  { %445 = vmatprep.subr.bf16.mxu1 %v1934_v9  ;;  %v288_v17 = vld [vmem:[#allocation6 + $0x7] sm:$0x1] }
   0xe   :  { %v289_v19 = vunpack.c.l.bf16 %v288_v17 }
   0xf   :  { %258 = vmatpush1.bf16.msra.mxu0 %v1941_v11  ;;  %341 = vrot.lane.b32.xlu1 %v1669_v13, %s1854_s7  ;;  %v473_v13 = vld [vmem:[#allocation5 + $0x1] sm:$0x1] }
  0x10   :  { %446 = vmatpush1.bf16.msra.mxu1 %v1941_v11  ;;  %605 = vmatprep.subr.bf16.mxu0 %v1887_v0  ;;  %v474_v15 = vunpack.c.l.bf16 %v473_v13 }
  0x11   :  { %771 = vmatprep.subr.bf16.mxu1 %v1887_v0 }
  0x12   :  { %1665 = vmatmul.mubr.msk.bf16.vlgmr.msra.gmra.mxu0 %vm239_vm2, %v198_v14 }
  0x13   :  { %606 = vmatpush1.bf16.msra.mxu0 %v1892_v1  ;;  %629 = vmatprep.mubr.bf16.mxu0 %v1852_v2  ;;  %v477_v14 = vld [vmem:[#allocation6 + $0x6] sm:$0x1] }
  0x14   :  { %607 = vmatprep.subr.bf16.mxu0 %v1900_v3  ;;  %v478_v16 = vunpack.c.l.bf16 %v477_v14 }
  0x17   :  { %608 = vmatpush1.bf16.msra.mxu0 %v1908_v5 }
  0x18   :  { %609 = vmatprep.subr.bf16.mxu0 %v1917_v6 }
  0x1b   :  { %610 = vmatpush1.bf16.msra.mxu0 %v1927_v8 }
  0x1c   :  { %611 = vmatprep.subr.bf16.mxu0 %v1934_v9 }
  0x1f   :  { %612 = vmatpush1.bf16.msra.mxu0 %v1941_v11 }
  0x20   :  { %937 = vmatprep.subr.bf16.mxu0 %v1887_v0 }
  0x7d   :  { %v307_v40 = vpop.permute.xlu1 %306 }
  0x81   :  { %v342_v42 = vpop.permute.xlu1 %341 }
  0xd2   :  { %v277_v20 = vpop.f32.mrf.mxu0 }
  0xd3   :  { %v286_v21 = vadd.f32 %v285_v18, %v277_v20 }
  0xd4   :  { %v279_v22 = vpop.f32.mrf.mxu0 }
  0xd5   :  { %1724 = vtanh.f32 %v286_v21  ;;  %v290_v23 = vadd.f32 %v289_v19, %v279_v22  ;;  %v1666_v28 = vmul.f32 -1.442695, %v286_v21 }
  0xd6   :  { %v281_v24 = vpop.f32.mrf.mxu0 }
  0xd7   :  { %1726 = vtanh.f32 %v290_v23  ;;  %v1668_v29 = vmul.f32 -1.442695, %v290_v23 }
  0xd8   :  { %v282_v25 = vpop.f32.mrf.mxu0  ;;  %1728 = vpow2.f32 %v1666_v28 }
  0xd9   :  { %1730 = vpow2.f32 %v1668_v29 }
  0xe2   :  { %v1725_v26 = vpop.eup %1724 }
  0xe3   :  { %311 = vrot.lane.b32.xlu0 %v1725_v26, %s1855_s9 }
  0xe4   :  { %v1727_v27 = vpop.eup %1726 }
  0xe5   :  { %v1729_v30 = vpop.eup %1728 }
  0xe6   :  { %v294_v31 = vadd.f32 1.0, %v1729_v30  ;;  %v1731_v32 = vpop.eup %1730 }
  0xe7   :  { %346 = vrot.lane.b32.xlu0 %v1727_v27, %s1855_s9  ;;  %v329_v33 = vadd.f32 1.0, %v1731_v32 }
  0xe8   :  { %1732 = vrcp.f32 %v294_v31 }
  0xe9   :  { %1734 = vrcp.f32 %v329_v33 }
  0xf5   :  { %v1733_v34 = vpop.eup %1732 }
  0xf6   :  { %v1735_v37 = vpop.eup %1734  ;;  %v309_v41 = vmul.f32 %v1733_v34, %v307_v40 }
  0xf7   :  { %v344_v45 = vmul.f32 %v1735_v37, %v342_v42 }
 0x155   :  { %v312_v35 = vpop.permute.xlu0 %311 }
 0x156   :  { %v314_v36 = vmul.f32 %v1733_v34, %v312_v35 }
 0x158   :  { %316 = vrot.lane.b32.xlu0 %v314_v36, %s1854_s7 }
 0x159   :  { %v347_v38 = vpop.permute.xlu0 %346 }
 0x15a   :  { %v349_v39 = vmul.f32 %v1735_v37, %v347_v38 }
 0x15c   :  { %351 = vrot.lane.b32.xlu1 %v349_v39, %s1854_s7 }
 0x1ca   :  { %v317_v43 = vpop.permute.xlu0 %316 }
 0x1cb   :  { %v1969_v44 = vadd.f32 %v317_v43, %v309_v41 }
 0x1cd   :  { %1736 = vtanh.f32 %v1969_v44 }
 0x1ce   :  { %v352_v46 = vpop.permute.xlu1 %351 }
 0x1cf   :  { %v1972_v47 = vadd.f32 %v352_v46, %v344_v45 }
 0x1d1   :  { %1738 = vtanh.f32 %v1972_v47 }
 0x1da   :  { %v1737_v48 = vpop.eup %1736 }
 0x1db   :  { %322 = vrot.lane.b32.xlu0 %v1737_v48, %s1855_s9 }
 0x1de   :  { %v1739_v49 = vpop.eup %1738 }
 0x1df   :  { %357 = vrot.lane.b32.xlu1 %v1739_v49, %s1855_s9 }
 0x24d   :  { %v323_v57 = vpop.permute.xlu0 %322 }
 0x24e   :  { %v1985_v58 = vmul.f32 %v1733_v34, %v323_v57 }
 0x250   :  { %v410_v59 = vrot.slane %v1985_v58, %v1980_v55 }
 0x251   :  { %v358_v60 = vpop.permute.xlu1 %357 }
 0x252   :  { %v1989_v61 = vmul.f32 %v1735_v37, %v358_v60  ;;  %411 = vrot.lane.b32.xlu0 %v410_v59, %s1854_s7  ;;  %v1654_v59 = vld [vmem:[%s2399_s1 + $0xb] sm:$0x1] }
 0x253   :  { %115 = vst [vmem:[#allocation6 + $0x5] sm:$0x1] %v1654_v59 }
 0x254   :  { %v421_v62 = vrot.slane %v1989_v61, %v1980_v55 }
 0x256   :  { %422 = vrot.lane.b32.xlu1 %v421_v62, %s1855_s9 }
 0x25a   :  { %v643_v62 = vld [vmem:[#allocation6 + $0x5] sm:$0x1] }
 0x2c4   :  { %v412_v63 = vpop.permute.xlu0 %411 }
 0x2c8   :  { %v423_v4 = vpop.permute.xlu1 %422 }
 0x2c9   :  { %v426_v7 = vsel %vm425_vm3, %v412_v63, %v423_v4  ;;  %v644_v4 = vunpack.c.l.bf16 %v643_v62 }
 0x2ca   :  { %v427_v10 = vpack.c.bf16 %v426_v7, %v426_v7 }
 0x2cc   :  { %1671 = vmatmul.mubr.msk.bf16.vlgmr.msra.gmra.mxu1 %vm239_vm2, %v427_v10 }
 0x2cd   :  { %772 = vmatpush1.bf16.msra.mxu1 %v1892_v1  ;;  %795 = vmatprep.mubr.bf16.mxu1 %v1852_v2 }
 0x2ce   :  { %773 = vmatprep.subr.bf16.mxu1 %v1900_v3 }
 0x2d1   :  { %774 = vmatpush1.bf16.msra.mxu1 %v1908_v5 }
 0x2d2   :  { %775 = vmatprep.subr.bf16.mxu1 %v1917_v6 }
 0x2d5   :  { %776 = vmatpush1.bf16.msra.mxu1 %v1927_v8 }
 0x2d6   :  { %777 = vmatprep.subr.bf16.mxu1 %v1934_v9 }
 0x2d9   :  { %778 = vmatpush1.bf16.msra.mxu1 %v1941_v11 }
 0x2da   :  { %1103 = vmatprep.subr.bf16.mxu1 %v1887_v0 }
 0x38c   :  { %v465_v17 = vpop.f32.mrf.mxu1 }
 0x38d   :  { %v475_v18 = vadd.f32 %v474_v15, %v465_v17 }
 0x38e   :  { %v467_v19 = vpop.f32.mrf.mxu1 }
 0x38f   :  { %1740 = vtanh.f32 %v475_v18  ;;  %v479_v20 = vadd.f32 %v478_v16, %v467_v19  ;;  %v1672_v25 = vmul.f32 -1.442695, %v475_v18 }
 0x390   :  { %v469_v21 = vpop.f32.mrf.mxu1 }
 0x391   :  { %1742 = vtanh.f32 %v479_v20  ;;  %v1673_v26 = vmul.f32 -1.442695, %v479_v20 }
 0x392   :  { %v470_v22 = vpop.f32.mrf.mxu1  ;;  %1744 = vpow2.f32 %v1672_v25 }
 0x393   :  { %1746 = vpow2.f32 %v1673_v26 }
 0x39c   :  { %v1741_v23 = vpop.eup %1740 }
 0x39d   :  { %489 = vrot.lane.b32.xlu0 %v1741_v23, %s1855_s9 }
 0x39e   :  { %v1743_v24 = vpop.eup %1742 }
 0x39f   :  { %513 = vrot.lane.b32.xlu1 %v1743_v24, %s1855_s9  ;;  %v1745_v27 = vpop.eup %1744 }
 0x3a0   :  { %v1747_v28 = vpop.eup %1746  ;;  %v483_v29 = vadd.f32 1.0, %v1745_v27 }
 0x3a1   :  { %v507_v30 = vadd.f32 1.0, %v1747_v28 }
 0x3a2   :  { %1748 = vrcp.f32 %v483_v29 }
 0x3a3   :  { %1750 = vrcp.f32 %v507_v30 }
 0x3af   :  { %v1749_v31 = vpop.eup %1748 }
 0x3b0   :  { %v1751_v34 = vpop.eup %1750  ;;  %v487_v37 = vmul.f32 %v1749_v31, %v1969_v44  ;;  %v32_v44 = vld [vmem:[%s2398_s0 + $0x4] sm:$0x1] }
 0x3b1   :  { %v511_v40 = vmul.f32 %v1751_v34, %v1972_v47  ;;  %33 = vst [vmem:[#allocation5 + $0x2] sm:$0x1] %v32_v44 }
 0x3b8   :  { %v639_v60 = vld [vmem:[#allocation5 + $0x2] sm:$0x1] }
 0x3b9   :  { %v640_v63 = vunpack.c.l.bf16 %v639_v60 }
 0x40f   :  { %v490_v32 = vpop.permute.xlu0 %489 }
 0x410   :  { %v492_v33 = vmul.f32 %v1749_v31, %v490_v32 }
 0x411   :  { %v514_v35 = vpop.permute.xlu1 %513 }
 0x412   :  { %494 = vrot.lane.b32.xlu0 %v492_v33, %s1854_s7  ;;  %v516_v36 = vmul.f32 %v1751_v34, %v514_v35 }
 0x414   :  { %518 = vrot.lane.b32.xlu1 %v516_v36, %s1854_s7 }
 0x484   :  { %v495_v38 = vpop.permute.xlu0 %494 }
 0x485   :  { %v2014_v39 = vadd.f32 %v495_v38, %v487_v37  ;;  %v34_v38 = vld [vmem:[%s2398_s0 + $0x6] sm:$0x1] }
 0x486   :  { %v519_v41 = vpop.permute.xlu1 %518  ;;  %35 = vst [vmem:[#allocation5 + $0x3] sm:$0x1] %v34_v38 }
 0x487   :  { %1752 = vtanh.f32 %v2014_v39  ;;  %v2018_v42 = vadd.f32 %v519_v41, %v511_v40 }
 0x489   :  { %1754 = vtanh.f32 %v2018_v42 }
 0x494   :  { %v1753_v43 = vpop.eup %1752 }
 0x495   :  { %500 = vrot.lane.b32.xlu0 %v1753_v43, %s1855_s9 }
 0x496   :  { %v1755_v45 = vpop.eup %1754 }
 0x497   :  { %524 = vrot.lane.b32.xlu1 %v1755_v45, %s1855_s9 }
 0x507   :  { %v501_v46 = vpop.permute.xlu0 %500 }
 0x508   :  { %v2026_v47 = vmul.f32 %v1749_v31, %v501_v46 }
 0x509   :  { %v525_v49 = vpop.permute.xlu1 %524 }
 0x50a   :  { %v577_v48 = vrot.slane %v2026_v47, %v1980_v55  ;;  %v2030_v50 = vmul.f32 %v1751_v34, %v525_v49 }
 0x50c   :  { %578 = vrot.lane.b32.xlu0 %v577_v48, %s1854_s7  ;;  %v588_v51 = vrot.slane %v2030_v50, %v1980_v55 }
 0x50e   :  { %589 = vrot.lane.b32.xlu1 %v588_v51, %s1855_s9  ;;  %v1653_v51 = vld [vmem:[%s2399_s1 + $0x9] sm:$0x1] }
 0x50f   :  { %113 = vst [vmem:[#allocation6 + $0x4] sm:$0x1] %v1653_v51 }
 0x57e   :  { %v579_v52 = vpop.permute.xlu0 %578 }
 0x580   :  { %v590_v54 = vpop.permute.xlu1 %589 }
 0x581   :  { %v592_v56 = vsel %vm425_vm3, %v579_v52, %v590_v54  ;;  %v805_v52 = vld [vmem:[#allocation5 + $0x3] sm:$0x1]  ;;  %v809_v54 = vld [vmem:[#allocation6 + $0x4] sm:$0x1] }
 0x582   :  { %v593_v57 = vpack.c.bf16 %v592_v56, %v592_v56  ;;  %v806_v56 = vunpack.c.l.bf16 %v805_v52 }
 0x584   :  { %1676 = vmatmul.mubr.msk.bf16.vlgmr.msra.gmra.mxu0 %vm239_vm2, %v593_v57  ;;  %v810_v57 = vunpack.c.l.bf16 %v809_v54 }
 0x585   :  { %938 = vmatpush1.bf16.msra.mxu0 %v1892_v1  ;;  %961 = vmatprep.mubr.bf16.mxu0 %v1852_v2 }
 0x586   :  { %939 = vmatprep.subr.bf16.mxu0 %v1900_v3 }
 0x589   :  { %940 = vmatpush1.bf16.msra.mxu0 %v1908_v5 }
 0x58a   :  { %941 = vmatprep.subr.bf16.mxu0 %v1917_v6 }
 0x58d   :  { %942 = vmatpush1.bf16.msra.mxu0 %v1927_v8 }
 0x58e   :  { %943 = vmatprep.subr.bf16.mxu0 %v1934_v9 }
 0x591   :  { %944 = vmatpush1.bf16.msra.mxu0 %v1941_v11 }
 0x592   :  { %1269 = vmatprep.subr.bf16.mxu0 %v1887_v0 }
 0x644   :  { %v631_v7 = vpop.f32.mrf.mxu0 }
 0x645   :  { %v641_v10 = vadd.f32 %v640_v63, %v631_v7 }
 0x646   :  { %v633_v12 = vpop.f32.mrf.mxu0 }
 0x647   :  { %1756 = vtanh.f32 %v641_v10  ;;  %v645_v13 = vadd.f32 %v644_v4, %v633_v12  ;;  %v1677_v18 = vmul.f32 -1.442695, %v641_v10 }
 0x648   :  { %v635_v14 = vpop.f32.mrf.mxu0 }
 0x649   :  { %1758 = vtanh.f32 %v645_v13  ;;  %v1678_v19 = vmul.f32 -1.442695, %v645_v13 }
 0x64a   :  { %v636_v15 = vpop.f32.mrf.mxu0  ;;  %1760 = vpow2.f32 %v1677_v18 }
 0x64b   :  { %1762 = vpow2.f32 %v1678_v19 }
 0x654   :  { %v1757_v16 = vpop.eup %1756 }
 0x655   :  { %655 = vrot.lane.b32.xlu0 %v1757_v16, %s1855_s9 }
 0x656   :  { %v1759_v17 = vpop.eup %1758 }
 0x657   :  { %679 = vrot.lane.b32.xlu1 %v1759_v17, %s1855_s9  ;;  %v1761_v20 = vpop.eup %1760 }
 0x658   :  { %v1763_v21 = vpop.eup %1762  ;;  %v649_v22 = vadd.f32 1.0, %v1761_v20 }
 0x659   :  { %v673_v23 = vadd.f32 1.0, %v1763_v21 }
 0x65a   :  { %1764 = vrcp.f32 %v649_v22 }
 0x65b   :  { %1766 = vrcp.f32 %v673_v23 }
 0x667   :  { %v1765_v24 = vpop.eup %1764 }
 0x668   :  { %v1767_v27 = vpop.eup %1766  ;;  %v653_v30 = vmul.f32 %v1765_v24, %v2014_v39 }
 0x669   :  { %v677_v33 = vmul.f32 %v1767_v27, %v2018_v42 }
 0x6c7   :  { %v656_v25 = vpop.permute.xlu0 %655 }
 0x6c8   :  { %v658_v26 = vmul.f32 %v1765_v24, %v656_v25 }
 0x6c9   :  { %v680_v28 = vpop.permute.xlu1 %679 }
 0x6ca   :  { %660 = vrot.lane.b32.xlu0 %v658_v26, %s1854_s7  ;;  %v682_v29 = vmul.f32 %v1767_v27, %v680_v28 }
 0x6cc   :  { %684 = vrot.lane.b32.xlu1 %v682_v29, %s1854_s7 }
 0x73c   :  { %v661_v31 = vpop.permute.xlu0 %660 }
 0x73d   :  { %v2055_v32 = vadd.f32 %v661_v31, %v653_v30 }
 0x73e   :  { %v685_v34 = vpop.permute.xlu1 %684 }
 0x73f   :  { %1768 = vtanh.f32 %v2055_v32  ;;  %v2059_v35 = vadd.f32 %v685_v34, %v677_v33 }
 0x741   :  { %1770 = vtanh.f32 %v2059_v35 }
 0x74c   :  { %v1769_v36 = vpop.eup %1768 }
 0x74d   :  { %666 = vrot.lane.b32.xlu0 %v1769_v36, %s1855_s9 }
 0x74e   :  { %v1771_v37 = vpop.eup %1770 }
 0x74f   :  { %690 = vrot.lane.b32.xlu1 %v1771_v37, %s1855_s9 }
 0x7bf   :  { %v667_v39 = vpop.permute.xlu0 %666 }
 0x7c0   :  { %v2067_v40 = vmul.f32 %v1765_v24, %v667_v39 }
 0x7c1   :  { %v691_v42 = vpop.permute.xlu1 %690 }
 0x7c2   :  { %v743_v41 = vrot.slane %v2067_v40, %v1980_v55  ;;  %v2071_v43 = vmul.f32 %v1767_v27, %v691_v42 }
 0x7c4   :  { %744 = vrot.lane.b32.xlu0 %v743_v41, %s1854_s7  ;;  %v754_v45 = vrot.slane %v2071_v43, %v1980_v55 }
 0x7c6   :  { %755 = vrot.lane.b32.xlu1 %v754_v45, %s1855_s9 }
 0x836   :  { %v745_v44 = vpop.permute.xlu0 %744 }
 0x838   :  { %v756_v46 = vpop.permute.xlu1 %755 }
 0x839   :  { %v758_v48 = vsel %vm425_vm3, %v745_v44, %v756_v46  ;;  %v1652_v44 = vld [vmem:[%s2399_s1 + $0x7] sm:$0x1] }
 0x83a   :  { %v759_v49 = vpack.c.bf16 %v758_v48, %v758_v48  ;;  %111 = vst [vmem:[#allocation6 + $0x3] sm:$0x1] %v1652_v44 }
 0x83c   :  { %1681 = vmatmul.mubr.msk.bf16.vlgmr.msra.gmra.mxu1 %vm239_vm2, %v759_v49 }
 0x83d   :  { %1104 = vmatpush1.bf16.msra.mxu1 %v1892_v1  ;;  %1127 = vmatprep.mubr.bf16.mxu1 %v1852_v2 }
 0x83e   :  { %1105 = vmatprep.subr.bf16.mxu1 %v1900_v3 }
 0x841   :  { %1106 = vmatpush1.bf16.msra.mxu1 %v1908_v5  ;;  %v975_v48 = vld [vmem:[#allocation6 + $0x3] sm:$0x1] }
 0x842   :  { %1107 = vmatprep.subr.bf16.mxu1 %v1917_v6  ;;  %v976_v51 = vunpack.c.l.bf16 %v975_v48 }
 0x845   :  { %1108 = vmatpush1.bf16.msra.mxu1 %v1927_v8 }
 0x846   :  { %1109 = vmatprep.subr.bf16.mxu1 %v1934_v9 }
 0x849   :  { %1110 = vmatpush1.bf16.msra.mxu1 %v1941_v11 }
 0x84a   :  { %1435 = vmatprep.subr.bf16.mxu1 %v1887_v0 }
 0x8fc   :  { %v797_v59 = vpop.f32.mrf.mxu1 }
 0x8fd   :  { %v807_v60 = vadd.f32 %v806_v56, %v797_v59 }
 0x8fe   :  { %v799_v62 = vpop.f32.mrf.mxu1 }
 0x8ff   :  { %1772 = vtanh.f32 %v807_v60  ;;  %v811_v63 = vadd.f32 %v810_v57, %v799_v62  ;;  %v1682_v12 = vmul.f32 -1.442695, %v807_v60 }
 0x900   :  { %v801_v4 = vpop.f32.mrf.mxu1 }
 0x901   :  { %1774 = vtanh.f32 %v811_v63  ;;  %v1683_v13 = vmul.f32 -1.442695, %v811_v63 }
 0x902   :  { %v802_v7 = vpop.f32.mrf.mxu1  ;;  %1776 = vpow2.f32 %v1682_v12 }
 0x903   :  { %1778 = vpow2.f32 %v1683_v13 }
 0x90c   :  { %v1773_v10 = vpop.eup %1772 }
 0x90d   :  { %821 = vrot.lane.b32.xlu0 %v1773_v10, %s1855_s9 }
 0x90e   :  { %v1775_v0 = vpop.eup %1774 }
 0x90f   :  { %845 = vrot.lane.b32.xlu1 %v1775_v0, %s1855_s9  ;;  %v1777_v14 = vpop.eup %1776 }
 0x910   :  { %v1779_v15 = vpop.eup %1778  ;;  %v815_v16 = vadd.f32 1.0, %v1777_v14 }
 0x911   :  { %v839_v17 = vadd.f32 1.0, %v1779_v15 }
 0x912   :  { %1780 = vrcp.f32 %v815_v16 }
 0x913   :  { %1782 = vrcp.f32 %v839_v17 }
 0x91f   :  { %v1781_v18 = vpop.eup %1780 }
 0x920   :  { %v1783_v21 = vpop.eup %1782  ;;  %v819_v24 = vmul.f32 %v1781_v18, %v2055_v32  ;;  %v36_v32 = vld [vmem:[%s2398_s0 + $0x8] sm:$0x1] }
 0x921   :  { %v843_v27 = vmul.f32 %v1783_v21, %v2059_v35  ;;  %37 = vst [vmem:[#allocation5 + $0x4] sm:$0x1] %v36_v32 }
 0x928   :  { %v971_v46 = vld [vmem:[#allocation5 + $0x4] sm:$0x1] }
 0x929   :  { %v972_v49 = vunpack.c.l.bf16 %v971_v46 }
 0x97f   :  { %v822_v19 = vpop.permute.xlu0 %821 }
 0x980   :  { %v824_v20 = vmul.f32 %v1781_v18, %v822_v19 }
 0x981   :  { %v846_v22 = vpop.permute.xlu1 %845 }
 0x982   :  { %826 = vrot.lane.b32.xlu0 %v824_v20, %s1854_s7  ;;  %v848_v23 = vmul.f32 %v1783_v21, %v846_v22 }
 0x984   :  { %850 = vrot.lane.b32.xlu1 %v848_v23, %s1854_s7 }
 0x9f4   :  { %v827_v25 = vpop.permute.xlu0 %826 }
 0x9f5   :  { %v2096_v26 = vadd.f32 %v827_v25, %v819_v24 }
 0x9f6   :  { %v851_v28 = vpop.permute.xlu1 %850 }
 0x9f7   :  { %1784 = vtanh.f32 %v2096_v26  ;;  %v2100_v29 = vadd.f32 %v851_v28, %v843_v27 }
 0x9f9   :  { %1786 = vtanh.f32 %v2100_v29 }
 0xa04   :  { %v1785_v30 = vpop.eup %1784 }
 0xa05   :  { %832 = vrot.lane.b32.xlu0 %v1785_v30, %s1855_s9 }
 0xa06   :  { %v1787_v31 = vpop.eup %1786 }
 0xa07   :  { %856 = vrot.lane.b32.xlu1 %v1787_v31, %s1855_s9 }
 0xa77   :  { %v833_v33 = vpop.permute.xlu0 %832 }
 0xa78   :  { %v2108_v34 = vmul.f32 %v1781_v18, %v833_v33 }
 0xa79   :  { %v857_v36 = vpop.permute.xlu1 %856 }
 0xa7a   :  { %v909_v35 = vrot.slane %v2108_v34, %v1980_v55  ;;  %v2112_v37 = vmul.f32 %v1783_v21, %v857_v36 }
 0xa7c   :  { %910 = vrot.lane.b32.xlu0 %v909_v35, %s1854_s7  ;;  %v920_v38 = vrot.slane %v2112_v37, %v1980_v55 }
 0xa7e   :  { %921 = vrot.lane.b32.xlu1 %v920_v38, %s1855_s9 }
 0xaee   :  { %v911_v39 = vpop.permute.xlu0 %910 }
 0xaf0   :  { %v922_v41 = vpop.permute.xlu1 %921 }
 0xaf1   :  { %v924_v42 = vsel %vm425_vm3, %v911_v39, %v922_v41 }
 0xaf2   :  { %v925_v45 = vpack.c.bf16 %v924_v42, %v924_v42  ;;  %v1651_v42 = vld [vmem:[%s2399_s1 + $0x5] sm:$0x1] }
 0xaf3   :  { %109 = vst [vmem:[#allocation6 + $0x2] sm:$0x1] %v1651_v42 }
 0xaf4   :  { %1686 = vmatmul.mubr.msk.bf16.vlgmr.msra.gmra.mxu0 %vm239_vm2, %v925_v45 }
 0xaf5   :  { %1270 = vmatpush1.bf16.msra.mxu0 %v1892_v1  ;;  %1293 = vmatprep.mubr.bf16.mxu0 %v1852_v2 }
 0xaf6   :  { %1271 = vmatprep.subr.bf16.mxu0 %v1900_v3 }
 0xaf9   :  { %1272 = vmatpush1.bf16.msra.mxu0 %v1908_v5 }
 0xafa   :  { %1273 = vmatprep.subr.bf16.mxu0 %v1917_v6  ;;  %v1141_v45 = vld [vmem:[#allocation6 + $0x2] sm:$0x1] }
 0xafb   :  { %v1142_v44 = vunpack.c.l.bf16 %v1141_v45 }
 0xafd   :  { %1274 = vmatpush1.bf16.msra.mxu0 %v1927_v8 }
 0xafe   :  { %1275 = vmatprep.subr.bf16.mxu0 %v1934_v9 }
 0xb01   :  { %1276 = vmatpush1.bf16.msra.mxu0 %v1941_v11 }
 0xbb4   :  { %v963_v52 = vpop.f32.mrf.mxu0 }
 0xbb5   :  { %v973_v54 = vadd.f32 %v972_v49, %v963_v52 }
 0xbb6   :  { %v965_v56 = vpop.f32.mrf.mxu0 }
 0xbb7   :  { %1788 = vtanh.f32 %v973_v54  ;;  %v977_v57 = vadd.f32 %v976_v51, %v965_v56  ;;  %v1687_v4 = vmul.f32 -1.442695, %v973_v54 }
 0xbb8   :  { %v967_v59 = vpop.f32.mrf.mxu0 }
 0xbb9   :  { %1790 = vtanh.f32 %v977_v57  ;;  %v1688_v7 = vmul.f32 -1.442695, %v977_v57 }
 0xbba   :  { %v968_v60 = vpop.f32.mrf.mxu0  ;;  %1792 = vpow2.f32 %v1687_v4 }
 0xbbb   :  { %1794 = vpow2.f32 %v1688_v7 }
 0xbc4   :  { %v1789_v62 = vpop.eup %1788 }
 0xbc5   :  { %987 = vrot.lane.b32.xlu0 %v1789_v62, %s1855_s9 }
 0xbc6   :  { %v1791_v63 = vpop.eup %1790 }
 0xbc7   :  { %1011 = vrot.lane.b32.xlu1 %v1791_v63, %s1855_s9  ;;  %v1793_v10 = vpop.eup %1792 }
 0xbc8   :  { %v1795_v0 = vpop.eup %1794  ;;  %v981_v12 = vadd.f32 1.0, %v1793_v10 }
 0xbc9   :  { %v1005_v13 = vadd.f32 1.0, %v1795_v0 }
 0xbca   :  { %1796 = vrcp.f32 %v981_v12 }
 0xbcb   :  { %1798 = vrcp.f32 %v1005_v13 }
 0xbd7   :  { %v1797_v14 = vpop.eup %1796 }
 0xbd8   :  { %v1799_v17 = vpop.eup %1798  ;;  %v985_v20 = vmul.f32 %v1797_v14, %v2096_v26  ;;  %v38_v26 = vld [vmem:[%s2398_s0 + $0xa] sm:$0x1] }
 0xbd9   :  { %v1009_v23 = vmul.f32 %v1799_v17, %v2100_v29  ;;  %39 = vst [vmem:[#allocation5 + $0x5] sm:$0x1] %v38_v26 }
 0xc37   :  { %v988_v15 = vpop.permute.xlu0 %987 }
 0xc38   :  { %v990_v16 = vmul.f32 %v1797_v14, %v988_v15 }
 0xc39   :  { %v1012_v18 = vpop.permute.xlu1 %1011 }
 0xc3a   :  { %992 = vrot.lane.b32.xlu0 %v990_v16, %s1854_s7  ;;  %v1014_v19 = vmul.f32 %v1799_v17, %v1012_v18  ;;  %v40_v18 = vld [vmem:[%s2398_s0 + $0xc] sm:$0x1] }
 0xc3b   :  { %41 = vst [vmem:[#allocation5 + $0x6] sm:$0x1] %v40_v18 }
 0xc3c   :  { %1016 = vrot.lane.b32.xlu1 %v1014_v19, %s1854_s7 }
 0xcac   :  { %v993_v21 = vpop.permute.xlu0 %992 }
 0xcad   :  { %v2136_v22 = vadd.f32 %v993_v21, %v985_v20 }
 0xcae   :  { %v1017_v24 = vpop.permute.xlu1 %1016 }
 0xcaf   :  { %1800 = vtanh.f32 %v2136_v22  ;;  %v2140_v25 = vadd.f32 %v1017_v24, %v1009_v23 }
 0xcb1   :  { %1802 = vtanh.f32 %v2140_v25 }
 0xcbc   :  { %v1801_v27 = vpop.eup %1800 }
 0xcbd   :  { %998 = vrot.lane.b32.xlu0 %v1801_v27, %s1855_s9 }
 0xcbe   :  { %v1803_v28 = vpop.eup %1802 }
 0xcbf   :  { %1022 = vrot.lane.b32.xlu1 %v1803_v28, %s1855_s9 }
 0xd2f   :  { %v999_v30 = vpop.permute.xlu0 %998 }
 0xd30   :  { %v2148_v29 = vmul.f32 %v1797_v14, %v999_v30  ;;  %v1650_v30 = vld [vmem:[%s2399_s1 + $0x3] sm:$0x1] }
 0xd31   :  { %v1023_v32 = vpop.permute.xlu1 %1022  ;;  %107 = vst [vmem:[#allocation6 + $0x1] sm:$0x1] %v1650_v30 }
 0xd32   :  { %v1075_v31 = vrot.slane %v2148_v29, %v1980_v55  ;;  %v2152_v33 = vmul.f32 %v1799_v17, %v1023_v32 }
 0xd34   :  { %1076 = vrot.lane.b32.xlu0 %v1075_v31, %s1854_s7  ;;  %v1086_v35 = vrot.slane %v2152_v33, %v1980_v55  ;;  %v1303_v31 = vld [vmem:[#allocation5 + $0x6] sm:$0x1] }
 0xd36   :  { %1087 = vrot.lane.b32.xlu1 %v1086_v35, %s1855_s9  ;;  %v1304_v35 = vunpack.c.l.bf16 %v1303_v31 }
 0xd38   :  { %v1307_v32 = vld [vmem:[#allocation6 + $0x1] sm:$0x1] }
 0xda6   :  { %v1077_v36 = vpop.permute.xlu0 %1076 }
 0xda8   :  { %v1088_v38 = vpop.permute.xlu1 %1087 }
 0xda9   :  { %v1090_v39 = vsel %vm425_vm3, %v1077_v36, %v1088_v38  ;;  %v1308_v36 = vunpack.c.l.bf16 %v1307_v32 }
 0xdaa   :  { %v1091_v41 = vpack.c.bf16 %v1090_v39, %v1090_v39 }
 0xdac   :  { %1691 = vmatmul.mubr.msk.bf16.vlgmr.msra.gmra.mxu1 %vm239_vm2, %v1091_v41 }
 0xdad   :  { %1436 = vmatpush1.bf16.msra.mxu1 %v1892_v1  ;;  %1459 = vmatprep.mubr.bf16.mxu1 %v1852_v2  ;;  %v1137_v1 = vld [vmem:[#allocation5 + $0x5] sm:$0x1] }
 0xdae   :  { %1437 = vmatprep.subr.bf16.mxu1 %v1900_v3  ;;  %v1138_v2 = vunpack.c.l.bf16 %v1137_v1 }
 0xdb1   :  { %1438 = vmatpush1.bf16.msra.mxu1 %v1908_v5 }
 0xdb2   :  { %1439 = vmatprep.subr.bf16.mxu1 %v1917_v6 }
 0xdb5   :  { %1440 = vmatpush1.bf16.msra.mxu1 %v1927_v8 }
 0xdb6   :  { %1441 = vmatprep.subr.bf16.mxu1 %v1934_v9 }
 0xdb9   :  { %1442 = vmatpush1.bf16.msra.mxu1 %v1941_v11 }
 0xe6c   :  { %v1129_v3 = vpop.f32.mrf.mxu1 }
 0xe6d   :  { %v1139_v46 = vadd.f32 %v1138_v2, %v1129_v3 }
 0xe6e   :  { %v1131_v5 = vpop.f32.mrf.mxu1 }
 0xe6f   :  { %1804 = vtanh.f32 %v1139_v46  ;;  %v1143_v6 = vadd.f32 %v1142_v44, %v1131_v5  ;;  %v1692_v49 = vmul.f32 -1.442695, %v1139_v46 }
 0xe70   :  { %v1133_v48 = vpop.f32.mrf.mxu1 }
 0xe71   :  { %1806 = vtanh.f32 %v1143_v6  ;;  %v1693_v51 = vmul.f32 -1.442695, %v1143_v6 }
 0xe72   :  { %v1134_v8 = vpop.f32.mrf.mxu1  ;;  %1808 = vpow2.f32 %v1692_v49 }
 0xe73   :  { %1810 = vpow2.f32 %v1693_v51 }
 0xe7c   :  { %v1805_v9 = vpop.eup %1804 }
 0xe7d   :  { %1153 = vrot.lane.b32.xlu0 %v1805_v9, %s1855_s9 }
 0xe7e   :  { %v1807_v11 = vpop.eup %1806 }
 0xe7f   :  { %1177 = vrot.lane.b32.xlu1 %v1807_v11, %s1855_s9  ;;  %v1809_v52 = vpop.eup %1808 }
 0xe80   :  { %v1811_v54 = vpop.eup %1810  ;;  %v1147_v56 = vadd.f32 1.0, %v1809_v52 }
 0xe81   :  { %v1171_v57 = vadd.f32 1.0, %v1811_v54 }
 0xe82   :  { %1812 = vrcp.f32 %v1147_v56 }
 0xe83   :  { %1814 = vrcp.f32 %v1171_v57 }
 0xe8f   :  { %v1813_v59 = vpop.eup %1812 }
 0xe90   :  { %v1815_v63 = vpop.eup %1814  ;;  %v1151_v10 = vmul.f32 %v1813_v59, %v2136_v22 }
 0xe91   :  { %v1175_v13 = vmul.f32 %v1815_v63, %v2140_v25 }
 0xeef   :  { %v1154_v60 = vpop.permute.xlu0 %1153 }
 0xef0   :  { %v1156_v62 = vmul.f32 %v1813_v59, %v1154_v60 }
 0xef1   :  { %v1178_v4 = vpop.permute.xlu1 %1177 }
 0xef2   :  { %1158 = vrot.lane.b32.xlu0 %v1156_v62, %s1854_s7  ;;  %v1180_v7 = vmul.f32 %v1815_v63, %v1178_v4 }
 0xef4   :  { %1182 = vrot.lane.b32.xlu1 %v1180_v7, %s1854_s7 }
 0xf64   :  { %v1159_v0 = vpop.permute.xlu0 %1158 }
 0xf65   :  { %v1161_v12 = vadd.f32 %v1159_v0, %v1151_v10  ;;  %v42_v10 = vld [vmem:[%s2398_s0 + $0xe] sm:$0x1] }
 0xf66   :  { %v1183_v14 = vpop.permute.xlu1 %1182  ;;  %43 = vst [vmem:[#allocation5 + $0x7] sm:$0x1] %v42_v10 }
 0xf67   :  { %1816 = vtanh.f32 %v1161_v12  ;;  %v1185_v15 = vadd.f32 %v1183_v14, %v1175_v13 }
 0xf69   :  { %1818 = vtanh.f32 %v1185_v15 }
 0xf74   :  { %v1817_v16 = vpop.eup %1816 }
 0xf75   :  { %1164 = vrot.lane.b32.xlu0 %v1817_v16, %s1855_s9 }
 0xf76   :  { %v1819_v17 = vpop.eup %1818 }
 0xf77   :  { %1188 = vrot.lane.b32.xlu1 %v1819_v17, %s1855_s9 }
 0xfe7   :  { %v1165_v19 = vpop.permute.xlu0 %1164 }
 0xfe8   :  { %v2182_v20 = vmul.f32 %v1813_v59, %v1165_v19 }
 0xfe9   :  { %v1189_v22 = vpop.permute.xlu1 %1188 }
 0xfea   :  { %v1241_v21 = vrot.slane %v2182_v20, %v1980_v55  ;;  %v2186_v23 = vmul.f32 %v1815_v63, %v1189_v22  ;;  %v1649_v22 = vld [vmem:[%s2399_s1 + $0x1] sm:$0x1] }
 0xfeb   :  { %105 = vst [vmem:[#allocation6] sm:$0x1] %v1649_v22 }
 0xfec   :  { %1242 = vrot.lane.b32.xlu0 %v1241_v21, %s1854_s7  ;;  %v1252_v24 = vrot.slane %v2186_v23, %v1980_v55 }
 0xfee   :  { %1253 = vrot.lane.b32.xlu1 %v1252_v24, %s1855_s9  ;;  %v1469_v24 = vld [vmem:[#allocation5 + $0x7] sm:$0x1] }
0x105e   :  { %v1243_v25 = vpop.permute.xlu0 %1242 }
0x1060   :  { %v1254_v27 = vpop.permute.xlu1 %1253 }
0x1061   :  { %v1256_v28 = vsel %vm425_vm3, %v1243_v25, %v1254_v27  ;;  %v1472_v25 = vld [vmem:[#allocation6] sm:$0x1]  ;;  %v1470_v27 = vunpack.c.l.bf16 %v1469_v24  ;;  %v1026_v24 = vpack.c.bf16 %v2148_v29, %v2148_v29 }
0x1062   :  { %v1257_v26 = vpack.c.bf16 %v1256_v28, %v1256_v28  ;;  %v1473_v28 = vunpack.c.l.bf16 %v1472_v25 }
0x1064   :  { %1696 = vmatmul.mubr.msk.bf16.vlgmr.msra.gmra.mxu0 %vm239_vm2, %v1257_v26 }
0x1124   :  { %v1295_v38 = vpop.f32.mrf.mxu0 }
0x1125   :  { %v1305_v39 = vadd.f32 %v1304_v35, %v1295_v38 }
0x1126   :  { %v1297_v41 = vpop.f32.mrf.mxu0 }
0x1127   :  { %1820 = vtanh.f32 %v1305_v39  ;;  %v1309_v42 = vadd.f32 %v1308_v36, %v1297_v41  ;;  %v1697_v3 = vmul.f32 -1.442695, %v1305_v39 }
0x1128   :  { %v1299_v1 = vpop.f32.mrf.mxu0 }
0x1129   :  { %1822 = vtanh.f32 %v1309_v42  ;;  %v1698_v46 = vmul.f32 -1.442695, %v1309_v42 }
0x112a   :  { %v1300_v45 = vpop.f32.mrf.mxu0  ;;  %1824 = vpow2.f32 %v1697_v3 }
0x112b   :  { %1826 = vpow2.f32 %v1698_v46 }
0x1134   :  { %v1821_v2 = vpop.eup %1820 }
0x1135   :  { %1319 = vrot.lane.b32.xlu0 %v1821_v2, %s1855_s9 }
0x1136   :  { %v1823_v44 = vpop.eup %1822 }
0x1137   :  { %1343 = vrot.lane.b32.xlu1 %v1823_v44, %s1855_s9  ;;  %v1825_v5 = vpop.eup %1824 }
0x1138   :  { %v1827_v6 = vpop.eup %1826  ;;  %v1313_v48 = vadd.f32 1.0, %v1825_v5 }
0x1139   :  { %v1337_v8 = vadd.f32 1.0, %v1827_v6 }
0x113a   :  { %1828 = vrcp.f32 %v1313_v48 }
0x113b   :  { %1830 = vrcp.f32 %v1337_v8 }
0x1147   :  { %v1829_v9 = vpop.eup %1828 }
0x1148   :  { %v1831_v51 = vpop.eup %1830  ;;  %v1317_v56 = vmul.f32 %v1829_v9, %v1161_v12 }
0x1149   :  { %v1341_v60 = vmul.f32 %v1831_v51, %v1185_v15 }
0x11a7   :  { %v1320_v11 = vpop.permute.xlu0 %1319 }
0x11a8   :  { %v1322_v49 = vmul.f32 %v1829_v9, %v1320_v11 }
0x11a9   :  { %v1344_v52 = vpop.permute.xlu1 %1343 }
0x11aa   :  { %1324 = vrot.lane.b32.xlu0 %v1322_v49, %s1854_s7  ;;  %v1346_v54 = vmul.f32 %v1831_v51, %v1344_v52  ;;  %v1857_v52 = vmov 1966171168  }
0x11ac   :  { %1348 = vrot.lane.b32.xlu1 %v1346_v54, %s1854_s7  ;;  %v364_v54 = vunpack.c.l.s4 %v1857_v52 }
0x121c   :  { %v1325_v57 = vpop.permute.xlu0 %1324 }
0x121d   :  { %v1327_v59 = vadd.f32 %v1325_v57, %v1317_v56 }
0x121e   :  { %v1349_v62 = vpop.permute.xlu1 %1348 }
0x121f   :  { %1832 = vtanh.f32 %v1327_v59  ;;  %v1351_v63 = vadd.f32 %v1349_v62, %v1341_v60  ;;  %v365_v60 = vunpack.c.0.s8 %v364_v54 }
0x1221   :  { %1834 = vtanh.f32 %v1351_v63  ;;  %v2240_v62 = vsub.s32 %v365_v60, %v1977_v53  ;;  %v549_v53 = vpack.c.bf16 %v2030_v50, %v2030_v50 }
0x122c   :  { %v1833_v4 = vpop.eup %1832 }
0x122d   :  { %1330 = vrot.lane.b32.xlu0 %v1833_v4, %s1855_s9  ;;  %v382_v4 = vpack.c.bf16 %v1989_v61, %v1989_v61 }
0x122e   :  { %v1835_v7 = vpop.eup %1834 }
0x122f   :  { %1354 = vrot.lane.b32.xlu1 %v1835_v7, %s1855_s9  ;;  %v528_v7 = vpack.c.bf16 %v2026_v47, %v2026_v47  ;;  %v557_v47 = vrot.slane %v549_v53, %v2240_v62 }
0x129f   :  { %v1331_v0 = vpop.permute.xlu0 %1330 }
0x12a0   :  { %v2206_v12 = vmul.f32 %v1829_v9, %v1331_v0  ;;  %v390_v0 = vrot.slane %v382_v4, %v2240_v62 }
0x12a1   :  { %v1355_v14 = vpop.permute.xlu1 %1354 }
0x12a2   :  { %v1407_v13 = vrot.slane %v2206_v12, %v1980_v55  ;;  %v2210_v15 = vmul.f32 %v1831_v51, %v1355_v14  ;;  %v536_v14 = vrot.slane %v528_v7, %v2240_v62 }
0x12a4   :  { %1408 = vrot.lane.b32.xlu0 %v1407_v13, %s1854_s7  ;;  %v1418_v16 = vrot.slane %v2210_v15, %v1980_v55 }
0x12a6   :  { %1419 = vrot.lane.b32.xlu1 %v1418_v16, %s1855_s9  ;;  %v715_v16 = vpack.c.bf16 %v2071_v43, %v2071_v43  ;;  %v564_v43 = vrot.slane %v557_v47, %v2240_v62 }
0x1316   :  { %v1409_v17 = vpop.permute.xlu0 %1408 }
0x1318   :  { %v1420_v18 = vpop.permute.xlu1 %1419 }
0x1319   :  { %v1422_v19 = vsel %vm425_vm3, %v1409_v17, %v1420_v18  ;;  %v397_v17 = vrot.slane %v390_v0, %v2240_v62  ;;  %v860_v18 = vpack.c.bf16 %v2108_v34, %v2108_v34 }
0x131a   :  { %v1423_v21 = vpack.c.bf16 %v1422_v19, %v1422_v19  ;;  %v723_v19 = vrot.slane %v715_v16, %v2240_v62 }
0x131b   :  { %v868_v22 = vrot.slane %v860_v18, %v2240_v62 }
0x131c   :  { %1701 = vmatmul.mubr.msk.bf16.vlgmr.msra.gmra.mxu1 %vm239_vm2, %v1423_v21  ;;  %v881_v21 = vpack.c.bf16 %v2112_v37, %v2112_v37  ;;  %v730_v37 = vrot.slane %v723_v19, %v2240_v62 }
0x131d   :  { %v875_v29 = vrot.slane %v868_v22, %v2240_v62 }
0x131e   :  { %v889_v25 = vrot.slane %v881_v21, %v2240_v62 }
0x13dc   :  { %v1461_v26 = vpop.f32.mrf.mxu1 }
0x13dd   :  { %v1471_v30 = vadd.f32 %v1470_v27, %v1461_v26  ;;  %v1047_v27 = vpack.c.bf16 %v2152_v33, %v2152_v33  ;;  %v1192_v26 = vpack.c.bf16 %v2182_v20, %v2182_v20  ;;  %v896_v33 = vrot.slane %v889_v25, %v2240_v62 }
0x13de   :  { %v1463_v31 = vpop.f32.mrf.mxu1 }
0x13df   :  { %1836 = vtanh.f32 %v1471_v30  ;;  %v1474_v32 = vadd.f32 %v1473_v28, %v1463_v31  ;;  %v1702_v41 = vmul.f32 -1.442695, %v1471_v30  ;;  %v1034_v28 = vrot.slane %v1026_v24, %v2240_v62 }
0x13e0   :  { %v1465_v35 = vpop.f32.mrf.mxu1  ;;  %v1055_v30 = vrot.slane %v1047_v27, %v2240_v62  ;;  %v1213_v31 = vpack.c.bf16 %v2186_v23, %v2186_v23 }
0x13e1   :  { %1838 = vtanh.f32 %v1474_v32  ;;  %v1703_v42 = vmul.f32 -1.442695, %v1474_v32  ;;  %v1200_v32 = vrot.slane %v1192_v26, %v2240_v62  ;;  %v1358_v35 = vpack.c.bf16 %v2206_v12, %v2206_v12 }
0x13e2   :  { %v1466_v36 = vpop.f32.mrf.mxu1  ;;  %1840 = vpow2.f32 %v1702_v41  ;;  %v1041_v20 = vrot.slane %v1034_v28, %v2240_v62  ;;  %v1062_v23 = vrot.slane %v1055_v30, %v2240_v62 }
0x13e3   :  { %1842 = vpow2.f32 %v1703_v42  ;;  %v1221_v36 = vrot.slane %v1213_v31, %v2240_v62  ;;  %v1207_v41 = vrot.slane %v1200_v32, %v2240_v62 }
0x13e5   :  { %v1228_v42 = vrot.slane %v1221_v36, %v2240_v62 }
0x13ec   :  { %v1837_v38 = vpop.eup %1836 }
0x13ed   :  { %1484 = vrot.lane.b32.xlu0 %v1837_v38, %s1855_s9  ;;  %v1379_v38 = vpack.c.bf16 %v2210_v15, %v2210_v15 }
0x13ee   :  { %v1839_v39 = vpop.eup %1838 }
0x13ef   :  { %1508 = vrot.lane.b32.xlu1 %v1839_v39, %s1855_s9  ;;  %v1841_v1 = vpop.eup %1840  ;;  %v1366_v39 = vrot.slane %v1358_v35, %v2240_v62  ;;  %v1387_v12 = vrot.slane %v1379_v38, %v2240_v62 }
0x13f0   :  { %v1843_v45 = vpop.eup %1842  ;;  %v1478_v2 = vadd.f32 1.0, %v1841_v1 }
0x13f1   :  { %v1502_v44 = vadd.f32 1.0, %v1843_v45  ;;  %v1373_v1 = vrot.slane %v1366_v39, %v2240_v62  ;;  %v1394_v15 = vrot.slane %v1387_v12, %v2240_v62 }
0x13f2   :  { %1844 = vrcp.f32 %v1478_v2 }
0x13f3   :  { %1846 = vrcp.f32 %v1502_v44 }
0x13ff   :  { %v2223_v3 = vpop.eup %1844 }
0x1400   :  { %v2226_v6 = vpop.eup %1846  ;;  %v1482_v9 = vmul.f32 %v2223_v3, %v1327_v59  ;;  %v361_v59 = vpack.c.bf16 %v1985_v58, %v1985_v58  ;;  %v694_v58 = vpack.c.bf16 %v2067_v40, %v2067_v40  ;;  %v543_v40 = vrot.slane %v536_v14, %v2240_v62 }
0x1401   :  { %v1506_v51 = vmul.f32 %v2226_v6, %v1351_v63 }
0x1402   :  { %v369_v63 = vrot.slane %v361_v59, %v2240_v62  ;;  %v702_v50 = vrot.slane %v694_v58, %v2240_v62 }
0x1404   :  { %v376_v61 = vrot.slane %v369_v63, %v2240_v62  ;;  %v709_v34 = vrot.slane %v702_v50, %v2240_v62 }
0x145f   :  { %v1485_v46 = vpop.permute.xlu0 %1484 }
0x1460   :  { %v1487_v5 = vmul.f32 %v2223_v3, %v1485_v46 }
0x1461   :  { %v1509_v48 = vpop.permute.xlu1 %1508 }
0x1462   :  { %1489 = vrot.lane.b32.xlu0 %v1487_v5, %s1854_s7  ;;  %v1511_v8 = vmul.f32 %v2226_v6, %v1509_v48 }
0x1464   :  { %1513 = vrot.lane.b32.xlu1 %v1511_v8, %s1854_s7 }
0x14d4   :  { %v1490_v11 = vpop.permute.xlu0 %1489 }
0x14d5   :  { %v2232_v49 = vadd.f32 %v1490_v11, %v1482_v9 }
0x14d6   :  { %v1514_v56 = vpop.permute.xlu1 %1513 }
0x14d7   :  { %1848 = vtanh.f32 %v2232_v49  ;;  %v2236_v57 = vadd.f32 %v1514_v56, %v1506_v51  ;;  %v1596_v60 = vrot.slane %v2232_v49, %v1980_v55 }
0x14d9   :  { %1850 = vtanh.f32 %v2236_v57 }
0x14e4   :  { %v1849_v10 = vpop.eup %1848 }
0x14e5   :  { %1495 = vrot.lane.b32.xlu0 %v1849_v10, %s1855_s9 }
0x14e6   :  { %v1851_v13 = vpop.eup %1850 }
0x14e7   :  { %1519 = vrot.lane.b32.xlu1 %v1851_v13, %s1855_s9 }
0x14e9   :  { %377 = vrot.lane.b32.xlu0 %v376_v61, %s1854_s7 }
0x14eb   :  { %398 = vrot.lane.b32.xlu1 %v397_v17, %s1854_s7 }
0x14ed   :  { %544 = vrot.lane.b32.xlu0 %v543_v40, %s1854_s7 }
0x14ef   :  { %565 = vrot.lane.b32.xlu1 %v564_v43, %s1854_s7 }
0x14f1   :  { %710 = vrot.lane.b32.xlu0 %v709_v34, %s1854_s7 }
0x14f3   :  { %731 = vrot.lane.b32.xlu1 %v730_v37, %s1854_s7 }
0x14f5   :  { %876 = vrot.lane.b32.xlu0 %v875_v29, %s1854_s7 }
0x14f7   :  { %897 = vrot.lane.b32.xlu1 %v896_v33, %s1854_s7 }
0x14f9   :  { %1042 = vrot.lane.b32.xlu0 %v1041_v20, %s1854_s7 }
0x14fb   :  { %1063 = vrot.lane.b32.xlu1 %v1062_v23, %s1854_s7 }
0x14fd   :  { %1208 = vrot.lane.b32.xlu0 %v1207_v41, %s1854_s7 }
0x14ff   :  { %1229 = vrot.lane.b32.xlu1 %v1228_v42, %s1854_s7 }
0x1501   :  { %1374 = vrot.lane.b32.xlu0 %v1373_v1, %s1854_s7 }
0x1503   :  { %1395 = vrot.lane.b32.xlu1 %v1394_v15, %s1854_s7 }
0x1557   :  { %v1496_v45 = vpop.permute.xlu0 %1495 }
0x1558   :  { %v1498_v2 = vmul.f32 %v2223_v3, %v1496_v45 }
0x1559   :  { %v1520_v5 = vpop.permute.xlu1 %1519 }
0x155a   :  { %v1523_v44 = vpack.c.bf16 %v1498_v2, %v1498_v2  ;;  %v1571_v46 = vrot.slane %v1498_v2, %v1980_v55  ;;  %v1522_v48 = vmul.f32 %v2226_v6, %v1520_v5 }
0x155b   :  { %v378_v8 = vpop.permute.xlu0 %377 }
0x155c   :  { %v1531_v9 = vrot.slane %v1523_v44, %v2240_v62  ;;  %381 = vst.msk [vmem:[%s2401_s3] sm:$0x1] %vm380_vm4, %v378_v8  ;;  %1572 = vrot.lane.b32.xlu0 %v1571_v46, %s1854_s7  ;;  %v1544_v11 = vpack.c.bf16 %v1522_v48, %v1522_v48  ;;  %v1582_v3 = vrot.slane %v1522_v48, %v1980_v55 }
0x155d   :  { %v399_v51 = vpop.permute.xlu1 %398 }
0x155e   :  { %v1538_v52 = vrot.slane %v1531_v9, %v2240_v62  ;;  %v1552_v54 = vrot.slane %v1544_v11, %v2240_v62  ;;  %1670 = vst.msk [vmem:[%s2402_s4 + $0x7] sm:$0x1] %vm380_vm4, %v399_v51  ;;  %1583 = vrot.lane.b32.xlu1 %v1582_v3, %s1855_s9 }
0x155f   :  { %v545_v6 = vpop.permute.xlu0 %544 }
0x1560   :  { %1674 = vst.msk [vmem:[%s2401_s3 + $0x1] sm:$0x1] %vm380_vm4, %v545_v6  ;;  %1539 = vrot.lane.b32.xlu0 %v1538_v52, %s1854_s7  ;;  %v1559_v56 = vrot.slane %v1552_v54, %v2240_v62  ;;  %v1609_v62 = vrot.slane %v2236_v57, %v1980_v55 }
0x1561   :  { %v566_v59 = vpop.permute.xlu1 %565 }
0x1562   :  { %1675 = vst.msk [vmem:[%s2402_s4 + $0x6] sm:$0x1] %vm380_vm4, %v566_v59  ;;  %1560 = vrot.lane.b32.xlu1 %v1559_v56, %s1854_s7 }
0x1563   :  { %v711_v4 = vpop.permute.xlu0 %710 }
0x1564   :  { %1679 = vst.msk [vmem:[%s2401_s3 + $0x2] sm:$0x1] %vm380_vm4, %v711_v4  ;;  %1597 = vrot.lane.b32.xlu0 %v1596_v60, %s1858_s20 }
0x1565   :  { %v732_v49 = vpop.permute.xlu1 %731 }
0x1566   :  { %1680 = vst.msk [vmem:[%s2402_s4 + $0x5] sm:$0x1] %vm380_vm4, %v732_v49  ;;  %1610 = vrot.lane.b32.xlu1 %v1609_v62, %s1858_s20 }
0x1567   :  { %v877_v63 = vpop.permute.xlu0 %876 }
0x1568   :  { %1684 = vst.msk [vmem:[%s2401_s3 + $0x3] sm:$0x1] %vm380_vm4, %v877_v63 }
0x1569   :  { %v898_v7 = vpop.permute.xlu1 %897 }
0x156a   :  { %1685 = vst.msk [vmem:[%s2402_s4 + $0x4] sm:$0x1] %vm380_vm4, %v898_v7 }
0x156b   :  { %v1043_v55 = vpop.permute.xlu0 %1042 }
0x156c   :  { %1689 = vst.msk [vmem:[%s2401_s3 + $0x4] sm:$0x1] %vm380_vm4, %v1043_v55 }
0x156d   :  { %v1064_v57 = vpop.permute.xlu1 %1063 }
0x156e   :  { %1690 = vst.msk [vmem:[%s2402_s4 + $0x3] sm:$0x1] %vm380_vm4, %v1064_v57 }
0x156f   :  { %v1209_v10 = vpop.permute.xlu0 %1208 }
0x1570   :  { %1694 = vst.msk [vmem:[%s2401_s3 + $0x5] sm:$0x1] %vm380_vm4, %v1209_v10 }
0x1571   :  { %v1230_v0 = vpop.permute.xlu1 %1229 }
0x1572   :  { %1695 = vst.msk [vmem:[%s2402_s4 + $0x2] sm:$0x1] %vm380_vm4, %v1230_v0 }
0x1573   :  { %v1375_v53 = vpop.permute.xlu0 %1374 }
0x1574   :  { %1699 = vst.msk [vmem:[%s2401_s3 + $0x6] sm:$0x1] %vm380_vm4, %v1375_v53 }
0x1575   :  { %v1396_v13 = vpop.permute.xlu1 %1395 }
0x1576   :  { %1700 = vst.msk [vmem:[%s2402_s4 + $0x1] sm:$0x1] %vm380_vm4, %v1396_v13 }
0x15ce   :  { %v1573_v14 = vpop.permute.xlu0 %1572 }
0x15d0   :  { %v1584_v58 = vpop.permute.xlu1 %1583 }
0x15d1   :  { %v1586_v61 = vsel %vm425_vm3, %v1573_v14, %v1584_v58 }
0x15d2   :  { %v1540_v47 = vpop.permute.xlu0 %1539  ;;  %1588 = vst.msk [vmem:[#allocation2] sm:$0x3] %vm182_vm0, %v1586_v61 }
0x15d3   :  { %1704 = vst.msk [vmem:[%s2401_s3 + $0x7] sm:$0x1] %vm380_vm4, %v1540_v47 }
0x15d4   :  { %v1561_v16 = vpop.permute.xlu1 %1560 }
0x15d5   :  { %1563 = vst.msk [vmem:[%s2402_s4] sm:$0x1] %vm380_vm4, %v1561_v16 }
0x15d6   :  { %v1598_v17 = vpop.permute.xlu0 %1597 }
0x15d7   :  { %1601 = vst.msk [vmem:[#allocation3] sm:$0x3] %vm184_vm1, %v1598_v17 }
0x15d8   :  { %v1611_v50 = vpop.permute.xlu1 %1610 }
0x15d9   :  { %1613 = vst.msk [vmem:[#allocation4] sm:$0x3] %vm184_vm1, %v1611_v50 }

</bundles_post_ra>
